<compile_context>
chip_gen: v5e
topology: v5e:2x2
jax: 0.10.0
libtpu: 0.0.40
codegen_flags: <defaults>
</compile_context>

<pallas_src>
import functools

import jax
import jax.numpy as jnp
from jax.experimental import pallas as pl
from jax.experimental.pallas import tpu as pltpu


HID = 200      # encoder output width (fixed by nn.Linear(num_g, 200))
HID_P = 256    # padded to a lane multiple
H2 = HID // 2  # 100
H2_P = 128     # padded to a lane multiple


def clf_kernel(xT_ref, y_ref, we_ref, be_ref, w1_ref, b1_ref, w2_ref, b2_ref,
               loss_ref, pred_ref, probsT_ref):
    # Batch lives on the lane axis: activations are (features, TB).
    xT = xT_ref[...]                                               # (G, TB)

    # h = sigmoid(encoder(X)) : (HID_P, G) @ (G, TB) + (HID_P, 1)
    h = jnp.dot(we_ref[...], xT, preferred_element_type=jnp.float32)
    h = jax.nn.sigmoid(h + be_ref[...])                            # f32

    # h = sigmoid(fc1(h)) : (H2_P, HID_P) @ (HID_P, TB) + (H2_P, 1)
    h = jnp.dot(w1_ref[...], h.astype(w1_ref.dtype),
                preferred_element_type=jnp.float32)
    h = jax.nn.sigmoid(h + b1_ref[...])                            # f32

    # logits : (L, H2_P) @ (H2_P, TB) + (L, 1)
    out = jnp.dot(w2_ref[...], h.astype(w2_ref.dtype),
                  preferred_element_type=jnp.float32) + b2_ref[...]  # (L, TB)
    L, TB = out.shape

    # softmax over the class axis (axis 0 = sublanes, only L=4 rows)
    m = jnp.max(out, axis=0, keepdims=True)                        # (1, TB)
    e = jnp.exp(out - m)                                           # (L, TB)
    s = jnp.sum(e, axis=0, keepdims=True)                          # (1, TB)
    # exact reciprocal keeps 1e-5 parity with the f32 reference
    probsT_ref[...] = e * pl.reciprocal(s, approx=False)

    # argmax(softmax(out)) == argmax(out); first-max index on ties
    row = jax.lax.broadcasted_iota(jnp.int32, (L, TB), 0)
    is_max = out >= m
    pred_ref[...] = jnp.min(jnp.where(is_max, row, L), axis=0,
                            keepdims=True).astype(jnp.int32)       # (1, TB)

    # per-example NLL:  logsumexp(out) - out[label]
    labels = y_ref[...]                                            # (1, TB) i32
    picked = jnp.sum(jnp.where(row == labels, out, 0.0),
                     axis=0, keepdims=True)                        # (1, TB)
    loss_ref[...] = (m + jnp.log(s)) - picked                      # (1, TB)


@functools.partial(jax.jit, static_argnames=("tile_b", "matmul_dtype"))
def clf_forward(x, y, params, *, tile_b=512, matmul_dtype=jnp.float32):
    """params are PyTorch-layout: weights (out, in), biases (out,)."""
    assert tile_b % 128 == 0
    we, be, w1, b1, w2, b2 = params
    B, G = x.shape
    L = w2.shape[0]

    # --- pad hidden dims to lane multiples (exact: the input columns of the
    #     next layer that see the padded sigmoid(0)=0.5 rows are zero). ---
    we_p = jnp.zeros((HID_P, G), jnp.float32).at[:HID, :].set(we)
    be_p = jnp.zeros((HID_P, 1), jnp.float32).at[:HID, 0].set(be)
    w1_p = jnp.zeros((H2_P, HID_P), jnp.float32).at[:H2, :HID].set(w1)
    b1_p = jnp.zeros((H2_P, 1), jnp.float32).at[:H2, 0].set(b1)
    w2_p = jnp.zeros((L, H2_P), jnp.float32).at[:, :H2].set(w2)
    b2_p = b2.reshape(L, 1).astype(jnp.float32)

    # --- batch tiling: batch on the lane axis; pad B to a tile multiple ---
    if B <= tile_b:
        TB = B                       # single tile; block == full array dims
        B_pad = B
    else:
        TB = tile_b
        B_pad = pl.cdiv(B, TB) * TB
    n_tiles = B_pad // TB

    xT = jnp.zeros((G, B_pad), jnp.float32).at[:, :B].set(x.T)
    y2 = jnp.zeros((1, B_pad), jnp.int32).at[0, :B].set(y.astype(jnp.int32))

    # bf16 only on MXU operands; all elementwise math stays f32 in-kernel.
    xT_in = xT.astype(matmul_dtype)
    we_in = we_p.astype(matmul_dtype)
    w1_in = w1_p.astype(matmul_dtype)
    w2_in = w2_p.astype(matmul_dtype)

    const = lambda i: (0, 0)   # resident weights: same block every grid step
    grid_spec = pltpu.PrefetchScalarGridSpec(
        num_scalar_prefetch=0,
        grid=(n_tiles,),
        in_specs=[
            pl.BlockSpec((G, TB), lambda i: (0, i)),     # x^T tile
            pl.BlockSpec((1, TB), lambda i: (0, i)),     # labels (lane-dense)
            pl.BlockSpec((HID_P, G), const),             # encoder W
            pl.BlockSpec((HID_P, 1), const),             # encoder b
            pl.BlockSpec((H2_P, HID_P), const),          # fc1 W
            pl.BlockSpec((H2_P, 1), const),              # fc1 b
            pl.BlockSpec((L, H2_P), const),              # fc2 W
            pl.BlockSpec((L, 1), const),                 # fc2 b
        ],
        out_specs=(
            pl.BlockSpec((1, TB), lambda i: (0, i)),     # per-example loss
            pl.BlockSpec((1, TB), lambda i: (0, i)),     # pred
            pl.BlockSpec((L, TB), lambda i: (0, i)),     # probs^T
        ),
    )

    loss_vec, pred_row, probsT = pl.pallas_call(
        clf_kernel,
        out_shape=(
            jax.ShapeDtypeStruct((1, B_pad), jnp.float32),
            jax.ShapeDtypeStruct((1, B_pad), jnp.int32),
            jax.ShapeDtypeStruct((L, B_pad), jnp.float32),
        ),
        grid_spec=grid_spec,
        compiler_params=pltpu.CompilerParams(
            dimension_semantics=("parallel",)),
    )(xT_in, y2, we_in, be_p, w1_in, b1_p, w2_in, b2_p)

    # finish the mean in the wrapper (keeps the batch axis parallel-legal)
    loss = jnp.sum(loss_vec[0, :B]) / B
    pred = pred_row[0, :B]
    probs = probsT[:, :B].T            # wrapper-side layout plumbing only
    return loss, pred, probs


def init_params(key, num_g, num_l):
    """Deterministic PyTorch-style uniform init; weights stored (out, in)."""
    def linear(key, fan_in, fan_out):
        kw, kb = jax.random.split(key)
        bound = 1.0 / jnp.sqrt(fan_in)
        w = jax.random.uniform(kw, (fan_out, fan_in), jnp.float32, -bound, bound)
        b = jax.random.uniform(kb, (fan_out,), jnp.float32, -bound, bound)
        return w, b

    k0, k1, k2 = jax.random.split(key, 3)
    we, be = linear(k0, num_g, HID)       # encoder.fc1: Linear(num_g, 200)
    w1, b1 = linear(k1, HID, HID // 2)    # clf.fc1
    w2, b2 = linear(k2, HID // 2, num_l)  # clf.fc2
    return we, be, w1, b1, w2, b2


def reference(x, y, params):
    we, be, w1, b1, w2, b2 = params
    h = jax.nn.sigmoid(x @ we.T + be)
    h = jax.nn.sigmoid(h @ w1.T + b1)
    out = h @ w2.T + b2
    probs = jax.nn.softmax(out, axis=1)
    logp = jax.nn.log_softmax(out, axis=1)
    loss = -jnp.mean(jnp.take_along_axis(logp, y[:, None], axis=1))
    return loss, jnp.argmax(out, axis=1), probs


if __name__ == "__main__":
    B, num_g, num_l = 8, 32, 4            # hid=200 is forced by Linear(num_g, 200)

    key = jax.random.PRNGKey(0)
    kx, ky, kp = jax.random.split(key, 3)
    x = jax.random.normal(kx, (B, num_g), jnp.float32)
    y = jax.random.randint(ky, (B,), 0, num_l, jnp.int32)
    params = init_params(kp, num_g, num_l)

    # f32 path: exact parity with the PyTorch-semantics reference
    loss, pred, probs = clf_forward(x, y, params)
    jax.block_until_ready((loss, pred, probs))

    rloss, rpred, rprobs = reference(x, y, params)
    assert jnp.allclose(loss, rloss, atol=1e-5), (loss, rloss)
    assert jnp.all(pred == rpred)
    assert jnp.allclose(probs, rprobs, atol=1e-5)

    # bf16-MXU path (v6e/v7x throughput option): looser tolerance by nature
    loss_bf, pred_bf, probs_bf = clf_forward(x, y, params,
                                             matmul_dtype=jnp.bfloat16)
    jax.block_until_ready((loss_bf, pred_bf, probs_bf))
    assert jnp.allclose(loss_bf, rloss, atol=3e-2)
    assert jnp.allclose(probs_bf, rprobs, atol=3e-2)

    print("KERNEL_OK")
</pallas_src>

<mosaic_0001>
module attributes {stable_mosaic.version = 11 : i64} {
  func.func @clf_kernel(%arg0: i32, %arg1: memref<32x8xf32, #tpu.memory_space<vmem>>, %arg2: memref<1x8xi32, #tpu.memory_space<vmem>>, %arg3: memref<256x32xf32, #tpu.memory_space<vmem>>, %arg4: memref<256x1xf32, #tpu.memory_space<vmem>>, %arg5: memref<128x256xf32, #tpu.memory_space<vmem>>, %arg6: memref<128x1xf32, #tpu.memory_space<vmem>>, %arg7: memref<4x128xf32, #tpu.memory_space<vmem>>, %arg8: memref<4x1xf32, #tpu.memory_space<vmem>>, %arg9: memref<1x8xf32, #tpu.memory_space<vmem>>, %arg10: memref<1x8xi32, #tpu.memory_space<vmem>>, %arg11: memref<4x8xf32, #tpu.memory_space<vmem>>) attributes {dimension_semantics = [#tpu.dimension_semantics<parallel>], iteration_bounds = array<i64: 1>, scalar_prefetch = 0 : i64, scratch_operands = 0 : i64, tpu.core_type = #tpu.core_type<tc>, window_params = [{transform_indices = @transform_0, window_bounds = array<i64: 32, 8>}, {transform_indices = @transform_1, window_bounds = array<i64: 1, 8>}, {pipeline_mode = #tpu.pipeline_mode<synchronous>, transform_indices = @transform_2, window_bounds = array<i64: 256, 32>}, {pipeline_mode = #tpu.pipeline_mode<synchronous>, transform_indices = @transform_3, window_bounds = array<i64: 256, 1>}, {pipeline_mode = #tpu.pipeline_mode<synchronous>, transform_indices = @transform_4, window_bounds = array<i64: 128, 256>}, {pipeline_mode = #tpu.pipeline_mode<synchronous>, transform_indices = @transform_5, window_bounds = array<i64: 128, 1>}, {pipeline_mode = #tpu.pipeline_mode<synchronous>, transform_indices = @transform_6, window_bounds = array<i64: 4, 128>}, {pipeline_mode = #tpu.pipeline_mode<synchronous>, transform_indices = @transform_7, window_bounds = array<i64: 4, 1>}, {transform_indices = @transform_8, window_bounds = array<i64: 1, 8>}, {transform_indices = @transform_9, window_bounds = array<i64: 1, 8>}, {transform_indices = @transform_10, window_bounds = array<i64: 4, 8>}]} {
    %c0 = arith.constant 0 : index
    %c0_0 = arith.constant 0 : index
    %0 = vector.load %arg1[%c0, %c0_0] : memref<32x8xf32, #tpu.memory_space<vmem>>, vector<32x8xf32>
    %c0_1 = arith.constant 0 : index
    %c0_2 = arith.constant 0 : index
    %1 = vector.load %arg3[%c0_1, %c0_2] : memref<256x32xf32, #tpu.memory_space<vmem>>, vector<256x32xf32>
    %cst = arith.constant dense<0.000000e+00> : vector<256x8xf32>
    %2 = tpu.matmul %1, %0, %cst {dimension_numbers = #tpu.dot_dimension_numbers<[1], [0], [0], [1], [0, 0, 1, 1], [], []>} : vector<256x32xf32>, vector<32x8xf32>, vector<256x8xf32> -> vector<256x8xf32>
    %c0_3 = arith.constant 0 : index
    %c0_4 = arith.constant 0 : index
    %3 = vector.load %arg4[%c0_3, %c0_4] : memref<256x1xf32, #tpu.memory_space<vmem>>, vector<256x1xf32>
    %4 = vector.broadcast %3 : vector<256x1xf32> to vector<256x8xf32>
    %5 = arith.addf %2, %4 : vector<256x8xf32>
    %6 = arith.negf %5 : vector<256x8xf32>
    %7 = math.exp %6 : vector<256x8xf32>
    %cst_5 = arith.constant 1.000000e+00 : f32
    %8 = vector.broadcast %cst_5 : f32 to vector<256x8xf32>
    %9 = arith.addf %8, %7 : vector<256x8xf32>
    %10 = arith.divf %8, %9 : vector<256x8xf32>
    %c0_6 = arith.constant 0 : index
    %c0_7 = arith.constant 0 : index
    %11 = vector.load %arg5[%c0_6, %c0_7] : memref<128x256xf32, #tpu.memory_space<vmem>>, vector<128x256xf32>
    %cst_8 = arith.constant dense<0.000000e+00> : vector<128x8xf32>
    %12 = tpu.matmul %11, %10, %cst_8 {dimension_numbers = #tpu.dot_dimension_numbers<[1], [0], [0], [1], [0, 0, 1, 1], [], []>} : vector<128x256xf32>, vector<256x8xf32>, vector<128x8xf32> -> vector<128x8xf32>
    %c0_9 = arith.constant 0 : index
    %c0_10 = arith.constant 0 : index
    %13 = vector.load %arg6[%c0_9, %c0_10] : memref<128x1xf32, #tpu.memory_space<vmem>>, vector<128x1xf32>
    %14 = vector.broadcast %13 : vector<128x1xf32> to vector<128x8xf32>
    %15 = arith.addf %12, %14 : vector<128x8xf32>
    %16 = arith.negf %15 : vector<128x8xf32>
    %17 = math.exp %16 : vector<128x8xf32>
    %cst_11 = arith.constant 1.000000e+00 : f32
    %18 = vector.broadcast %cst_11 : f32 to vector<128x8xf32>
    %19 = arith.addf %18, %17 : vector<128x8xf32>
    %20 = arith.divf %18, %19 : vector<128x8xf32>
    %c0_12 = arith.constant 0 : index
    %c0_13 = arith.constant 0 : index
    %21 = vector.load %arg7[%c0_12, %c0_13] : memref<4x128xf32, #tpu.memory_space<vmem>>, vector<4x128xf32>
    %cst_14 = arith.constant dense<0.000000e+00> : vector<4x8xf32>
    %22 = tpu.matmul %21, %20, %cst_14 {dimension_numbers = #tpu.dot_dimension_numbers<[1], [0], [0], [1], [0, 0, 1, 1], [], []>} : vector<4x128xf32>, vector<128x8xf32>, vector<4x8xf32> -> vector<4x8xf32>
    %c0_15 = arith.constant 0 : index
    %c0_16 = arith.constant 0 : index
    %23 = vector.load %arg8[%c0_15, %c0_16] : memref<4x1xf32, #tpu.memory_space<vmem>>, vector<4x1xf32>
    %24 = vector.broadcast %23 : vector<4x1xf32> to vector<4x8xf32>
    %25 = arith.addf %22, %24 : vector<4x8xf32>
    %cst_17 = arith.constant dense<0xFF800000> : vector<8xf32>
    %26 = vector.multi_reduction <maximumf>, %25, %cst_17 [0] : vector<4x8xf32> to vector<8xf32>
    %27 = vector.shape_cast %26 : vector<8xf32> to vector<1x8xf32>
    %28 = vector.broadcast %27 : vector<1x8xf32> to vector<4x8xf32>
    %29 = arith.subf %25, %28 : vector<4x8xf32>
    %30 = math.exp %29 : vector<4x8xf32>
    %cst_18 = arith.constant dense<0.000000e+00> : vector<8xf32>
    %31 = vector.multi_reduction <add>, %30, %cst_18 [0] : vector<4x8xf32> to vector<8xf32>
    %32 = vector.shape_cast %31 : vector<8xf32> to vector<1x8xf32>
    %33 = tpu.reciprocal %32 : vector<1x8xf32> -> vector<1x8xf32>
    %34 = vector.broadcast %33 : vector<1x8xf32> to vector<4x8xf32>
    %35 = arith.mulf %30, %34 : vector<4x8xf32>
    %c0_19 = arith.constant 0 : index
    %c0_20 = arith.constant 0 : index
    %36 = vector.load %arg11[%c0_19, %c0_20] : memref<4x8xf32, #tpu.memory_space<vmem>>, vector<4x8xf32>
    tpu.vector_store %arg11[%c0_19, %c0_20], %35 {strides = array<i32>} : memref<4x8xf32, #tpu.memory_space<vmem>>, vector<4x8xf32>,
    %37 = tpu.iota {dimensions = array<i32: 0>} : vector<4x8xi32>
    %38 = vector.broadcast %27 : vector<1x8xf32> to vector<4x8xf32>
    %39 = arith.cmpf oge, %25, %38 : vector<4x8xf32>
    %c4_i32 = arith.constant 4 : i32
    %40 = vector.broadcast %c4_i32 : i32 to vector<4x8xi32>
    %41 = arith.select %39, %37, %40 : vector<4x8xi1>, vector<4x8xi32>
    %cst_21 = arith.constant dense<2147483647> : vector<8xi32>
    %42 = vector.multi_reduction <minsi>, %41, %cst_21 [0] : vector<4x8xi32> to vector<8xi32>
    %43 = vector.shape_cast %42 : vector<8xi32> to vector<1x8xi32>
    %c0_22 = arith.constant 0 : index
    %c0_23 = arith.constant 0 : index
    %44 = vector.load %arg10[%c0_22, %c0_23] : memref<1x8xi32, #tpu.memory_space<vmem>>, vector<1x8xi32>
    tpu.vector_store %arg10[%c0_22, %c0_23], %43 {strides = array<i32>} : memref<1x8xi32, #tpu.memory_space<vmem>>, vector<1x8xi32>,
    %c0_24 = arith.constant 0 : index
    %c0_25 = arith.constant 0 : index
    %45 = vector.load %arg2[%c0_24, %c0_25] : memref<1x8xi32, #tpu.memory_space<vmem>>, vector<1x8xi32>
    %46 = vector.broadcast %45 : vector<1x8xi32> to vector<4x8xi32>
    %47 = arith.cmpi eq, %37, %46 : vector<4x8xi32>
    %cst_26 = arith.constant 0.000000e+00 : f32
    %48 = vector.broadcast %cst_26 : f32 to vector<4x8xf32>
    %49 = arith.select %47, %25, %48 : vector<4x8xi1>, vector<4x8xf32>
    %cst_27 = arith.constant dense<0.000000e+00> : vector<8xf32>
    %50 = vector.multi_reduction <add>, %49, %cst_27 [0] : vector<4x8xf32> to vector<8xf32>
    %51 = vector.shape_cast %50 : vector<8xf32> to vector<1x8xf32>
    %52 = math.log %32 : vector<1x8xf32>
    %53 = arith.addf %27, %52 : vector<1x8xf32>
    %54 = arith.subf %53, %51 : vector<1x8xf32>
    %c0_28 = arith.constant 0 : index
    %c0_29 = arith.constant 0 : index
    %55 = vector.load %arg9[%c0_28, %c0_29] : memref<1x8xf32, #tpu.memory_space<vmem>>, vector<1x8xf32>
    tpu.vector_store %arg9[%c0_28, %c0_29], %54 {strides = array<i32>} : memref<1x8xf32, #tpu.memory_space<vmem>>, vector<1x8xf32>,
    return
  }
  func.func @transform_0(%arg0: i32) -> (i32, i32) {
    %c0_i32 = arith.constant 0 : i32
    %c0_i32_0 = arith.constant 0 : i32
    return %c0_i32, %arg0 : i32, i32
  }
  func.func @transform_1(%arg0: i32) -> (i32, i32) {
    %c0_i32 = arith.constant 0 : i32
    %c0_i32_0 = arith.constant 0 : i32
    return %c0_i32, %arg0 : i32, i32
  }
  func.func @transform_2(%arg0: i32) -> (i32, i32) {
    %c0_i32 = arith.constant 0 : i32
    %c0_i32_0 = arith.constant 0 : i32
    %c0_i32_1 = arith.constant 0 : i32
    return %c0_i32, %c0_i32_0 : i32, i32
  }
  func.func @transform_3(%arg0: i32) -> (i32, i32) {
    %c0_i32 = arith.constant 0 : i32
    %c0_i32_0 = arith.constant 0 : i32
    %c0_i32_1 = arith.constant 0 : i32
    return %c0_i32, %c0_i32_0 : i32, i32
  }
  func.func @transform_4(%arg0: i32) -> (i32, i32) {
    %c0_i32 = arith.constant 0 : i32
    %c0_i32_0 = arith.constant 0 : i32
    %c0_i32_1 = arith.constant 0 : i32
    return %c0_i32, %c0_i32_0 : i32, i32
  }
  func.func @transform_5(%arg0: i32) -> (i32, i32) {
    %c0_i32 = arith.constant 0 : i32
    %c0_i32_0 = arith.constant 0 : i32
    %c0_i32_1 = arith.constant 0 : i32
    return %c0_i32, %c0_i32_0 : i32, i32
  }
  func.func @transform_6(%arg0: i32) -> (i32, i32) {
    %c0_i32 = arith.constant 0 : i32
    %c0_i32_0 = arith.constant 0 : i32
    %c0_i32_1 = arith.constant 0 : i32
    return %c0_i32, %c0_i32_0 : i32, i32
  }
  func.func @transform_7(%arg0: i32) -> (i32, i32) {
    %c0_i32 = arith.constant 0 : i32
    %c0_i32_0 = arith.constant 0 : i32
    %c0_i32_1 = arith.constant 0 : i32
    return %c0_i32, %c0_i32_0 : i32, i32
  }
  func.func @transform_8(%arg0: i32) -> (i32, i32) {
    %c0_i32 = arith.constant 0 : i32
    %c0_i32_0 = arith.constant 0 : i32
    return %c0_i32, %arg0 : i32, i32
  }
  func.func @transform_9(%arg0: i32) -> (i32, i32) {
    %c0_i32 = arith.constant 0 : i32
    %c0_i32_0 = arith.constant 0 : i32
    return %c0_i32, %arg0 : i32, i32
  }
  func.func @transform_10(%arg0: i32) -> (i32, i32) {
    %c0_i32 = arith.constant 0 : i32
    %c0_i32_0 = arith.constant 0 : i32
    return %c0_i32, %arg0 : i32, i32
  }
}

</mosaic_0001>

<bundles_post_ra>
// kernel: clf_forward.1
= control target key start
LH: loop header
LB: loop body
LE: loop exit
PB: predicated region body
PF: predicated region fallthrough
CT: control target
= control target key end

     0   :  { %16 = vsyncpa [#allocation3], 0  ;;  %v2112_v2 = vmov 0   ;;  %vm262_vm0 = vcmask 261120   ;;  %s4032_s0 = inlined_call_operand.vmem [shape: f32[32,8], index: 0, kind: input, shape index: {}]   ;;  %s4033_s1 = inlined_call_operand.vmem [shape: s32[1,8], index: 1, kind: input, shape index: {}]   ;;  %s4034_s2 = inlined_call_operand.vmem [shape: f32[256,32], index: 2, kind: input, shape index: {}]   ;;  %s4035_s3 = inlined_call_operand.vmem [shape: f32[256,1], index: 3, kind: input, shape index: {}]   ;;  %s4036_s4 = inlined_call_operand.vmem [shape: f32[128,256], index: 4, kind: input, shape index: {}]   ;;  %s4037_s5 = inlined_call_operand.vmem [shape: f32[128,1], index: 5, kind: input, shape index: {}]   ;;  %s4038_s6 = inlined_call_operand.vmem [shape: f32[4,128], index: 6, kind: input, shape index: {}]   ;;  %s4039_s7 = inlined_call_operand.vmem [shape: f32[4,1], index: 7, kind: input, shape index: {}]   ;;  %s4040_s8 = inlined_call_operand.vmem [shape: f32[1,8], index: 8, kind: output, shape index: {0}]   ;;  %s4041_s9 = inlined_call_operand.hbm [shape: s32[1,8], index: 9, kind: output, shape index: {1}]   ;;  %s4042_s10 = inlined_call_operand.hbm [shape: f32[4,8], index: 10, kind: output, shape index: {2}]  }
   0x1   :  { %v37_v0 = vld [vmem:[%s4032_s0 + $0x18] sm:$0xff]  ;;  %1860 = vset.pattern.permute.xlu2 %v2112_v2  ;;  %1859 = vset.pattern.permute.xlu1 %v2112_v2  ;;  %v84_v4 = vld [vmem:[%s4035_s3 + $0x70] sm:$0xff]  ;;  %v35_v6 = vld [vmem:[%s4032_s0 + $0x8] sm:$0xff] }
   0x2   :  { %v101_v1 = vld [vmem:[%s4035_s3 + $0xf8] sm:$0xff]  ;;  %1858 = vset.pattern.permute.xlu0 %v2112_v2  ;;  %371 = vmatpush.msra.mxu0 %v37_v0  ;;  %v36_v5 = vld [vmem:[%s4032_s0 + $0x10] sm:$0xff]  ;;  %v34_v7 = vld [vmem:[%s4032_s0] sm:$0xff] }
   0x3   :  { %v85_v3 = vld [vmem:[%s4035_s3 + $0x78] sm:$0xff]  ;;  %1851 = vmatpush.msra.mxu3 %v37_v0  ;;  %259 = vperm.xlu0 %1858, %v101_v1   ;;  %v38_v8 = vld [vmem:[%s4034_s2] sm:$0xff]  ;;  %v56_v9 = vld [vmem:[%s4034_s2 + $0x90] sm:$0xff] }
   0x4   :  { %179 = vperm.xlu1 %1859, %v85_v3   ;;  %174 = vperm.xlu2 %1860, %v84_v4   ;;  %v100_v10 = vld [vmem:[%s4035_s3 + $0xf0] sm:$0xff]  ;;  %v99_v11 = vld [vmem:[%s4035_s3 + $0xe8] sm:$0xff]  ;;  %v98_v12 = vld [vmem:[%s4035_s3 + $0xe0] sm:$0xff] }
   0x5   :  { %372 = vmatpush.msra.mxu0 %v36_v5  ;;  %1852 = vmatpush.msra.mxu3 %v36_v5 }
   0x7   :  { %373 = vmatpush.msra.mxu0 %v35_v6  ;;  %1853 = vmatpush.msra.mxu3 %v35_v6 }
   0x9   :  { %374 = vmatpush.msra.mxu0 %v34_v7  ;;  %1854 = vmatpush.msra.mxu3 %v34_v7 }
   0xa   :  { %1771 = vmatmul.msk.f32.vlgmr.msra.gmra.mxu0 %vm262_vm0, %v38_v8  ;;  %1789 = vmatmul.msk.f32.vlgmr.msra.gmra.mxu3 %vm262_vm0, %v56_v9 }
   0xb   :  { %17 = vsyncpa [#allocation5], 0  ;;  %254 = vperm.xlu0 %1858, %v100_v10   ;;  %v39_v13 = vld [vmem:[%s4034_s2 + $0x8] sm:$0xff]  ;;  %v57_v14 = vld [vmem:[%s4034_s2 + $0x98] sm:$0xff]  ;;  %s2113_s25 = smov [#allocation2]   ;;  %s1744_s28 = sshll.u32 %s4041_s9, 4  ;;  %s1745_s28 = int_to_ptr.hbm [resolvable:$true] %s1744_s28 }
   0xc   :  { %249 = vperm.xlu1 %1859, %v99_v11   ;;  %244 = vperm.xlu2 %1860, %v98_v12   ;;  %v83_v15 = vld [vmem:[%s4035_s3 + $0x68] sm:$0xff]  ;;  %v97_v16 = vld [vmem:[%s4035_s3 + $0xd8] sm:$0xff]  ;;  %v82_v17 = vld [vmem:[%s4035_s3 + $0x60] sm:$0xff]  ;;  %s1742_s26 = sshll.u32 %s2113_s25, 4  ;;  %s1743_s26 = int_to_ptr.vmem [resolvable:$true] %s1742_s26 }
   0xd   :  { %v40_v18 = vld [vmem:[%s4034_s2 + $0x10] sm:$0xff]  ;;  %v58_v19 = vld [vmem:[%s4034_s2 + $0xa0] sm:$0xff]  ;;  %v95_v21 = vld [vmem:[%s4035_s3 + $0xc8] sm:$0xff] }
   0xe   :  { %v96_v20 = vld [vmem:[%s4035_s3 + $0xd0] sm:$0xff]  ;;  %v81_v22 = vld [vmem:[%s4035_s3 + $0x58] sm:$0xff]  ;;  %v59_v24 = vld [vmem:[%s4034_s2 + $0xa8] sm:$0xff] }
   0xf   :  { %v41_v23 = vld [vmem:[%s4034_s2 + $0x18] sm:$0xff]  ;;  %v80_v25 = vld [vmem:[%s4035_s3 + $0x50] sm:$0xff]  ;;  %v94_v26 = vld [vmem:[%s4035_s3 + $0xc0] sm:$0xff] }
  0x10   :  { %v79_v27 = vld [vmem:[%s4035_s3 + $0x48] sm:$0xff]  ;;  %v42_v28 = vld [vmem:[%s4034_s2 + $0x20] sm:$0xff]  ;;  %v60_v29 = vld [vmem:[%s4034_s2 + $0xb0] sm:$0xff] }
  0x11   :  { %v93_v30 = vld [vmem:[%s4035_s3 + $0xb8] sm:$0xff]  ;;  %v92_v31 = vld [vmem:[%s4035_s3 + $0xb0] sm:$0xff]  ;;  %v78_v32 = vld [vmem:[%s4035_s3 + $0x40] sm:$0xff] }
  0x12   :  { %1772 = vmatmul.msk.f32.gmra.mxu0 %vm262_vm0, %v39_v13  ;;  %1790 = vmatmul.msk.f32.gmra.mxu3 %vm262_vm0, %v57_v14  ;;  %v43_v33 = vld [vmem:[%s4034_s2 + $0x28] sm:$0xff]  ;;  %v61_v34 = vld [vmem:[%s4034_s2 + $0xb8] sm:$0xff]  ;;  %v76_v37 = vld [vmem:[%s4035_s3 + $0x30] sm:$0xff] }
  0x13   :  { %169 = vperm.xlu0 %1858, %v83_v15   ;;  %v77_v35 = vld [vmem:[%s4035_s3 + $0x38] sm:$0xff]  ;;  %v91_v36 = vld [vmem:[%s4035_s3 + $0xa8] sm:$0xff]  ;;  %v44_v38 = vld [vmem:[%s4034_s2 + $0x30] sm:$0xff] }
  0x14   :  { %239 = vperm.xlu1 %1859, %v97_v16   ;;  %164 = vperm.xlu2 %1860, %v82_v17   ;;  %v62_v39 = vld [vmem:[%s4034_s2 + $0xc0] sm:$0xff]  ;;  %v89_v41 = vld [vmem:[%s4035_s3 + $0x98] sm:$0xff]  ;;  %v75_v42 = vld [vmem:[%s4035_s3 + $0x28] sm:$0xff] }
  0x15   :  { %v90_v40 = vld [vmem:[%s4035_s3 + $0xa0] sm:$0xff]  ;;  %v45_v43 = vld [vmem:[%s4034_s2 + $0x38] sm:$0xff]  ;;  %v63_v44 = vld [vmem:[%s4034_s2 + $0xc8] sm:$0xff] }
  0x16   :  { %v74_v45 = vld [vmem:[%s4035_s3 + $0x20] sm:$0xff]  ;;  %v88_v46 = vld [vmem:[%s4035_s3 + $0x90] sm:$0xff]  ;;  %v73_v47 = vld [vmem:[%s4035_s3 + $0x18] sm:$0xff] }
  0x17   :  { %v46_v48 = vld [vmem:[%s4034_s2 + $0x40] sm:$0xff]  ;;  %v64_v49 = vld [vmem:[%s4034_s2 + $0xd0] sm:$0xff]  ;;  %v87_v50 = vld [vmem:[%s4035_s3 + $0x88] sm:$0xff] }
  0x18   :  { %v86_v51 = vld [vmem:[%s4035_s3 + $0x80] sm:$0xff]  ;;  %v72_v52 = vld [vmem:[%s4035_s3 + $0x10] sm:$0xff]  ;;  %v47_v53 = vld [vmem:[%s4034_s2 + $0x48] sm:$0xff] }
  0x19   :  { %v65_v54 = vld [vmem:[%s4034_s2 + $0xd8] sm:$0xff]  ;;  %v71_v55 = vld [vmem:[%s4035_s3 + $0x8] sm:$0xff]  ;;  %v70_v57 = vld [vmem:[%s4035_s3] sm:$0xff] }
  0x1a   :  { %1773 = vmatmul.msk.f32.gmra.mxu0 %vm262_vm0, %v40_v18  ;;  %1791 = vmatmul.msk.f32.gmra.mxu3 %vm262_vm0, %v58_v19  ;;  %v1127_v56 = vld [vmem:[%s4037_s5 + $0x78] sm:$0xff]  ;;  %v48_v58 = vld [vmem:[%s4034_s2 + $0x50] sm:$0xff]  ;;  %v66_v59 = vld [vmem:[%s4034_s2 + $0xe0] sm:$0xff] }
  0x1b   :  { %234 = vperm.xlu0 %1858, %v96_v20   ;;  %v1126_v60 = vld [vmem:[%s4037_s5 + $0x70] sm:$0xff]  ;;  %v1124_v61 = vld [vmem:[%s4037_s5 + $0x60] sm:$0xff]  ;;  %v1125_v62 = vld [vmem:[%s4037_s5 + $0x68] sm:$0xff] }
  0x1c   :  { %229 = vperm.xlu2 %1860, %v95_v21   ;;  %159 = vperm.xlu1 %1859, %v81_v22   ;;  %v49_v0 = vld [vmem:[%s4034_s2 + $0x58] sm:$0xff]  ;;  %v67_v1 = vld [vmem:[%s4034_s2 + $0xe8] sm:$0xff]  ;;  %v1122_v4 = vld [vmem:[%s4037_s5 + $0x50] sm:$0xff] }
  0x1d   :  { %v1123_v2 = vld [vmem:[%s4037_s5 + $0x58] sm:$0xff]  ;;  %v1121_v3 = vld [vmem:[%s4037_s5 + $0x48] sm:$0xff]  ;;  %v50_v6 = vld [vmem:[%s4034_s2 + $0x60] sm:$0xff] }
  0x1e   :  { %v68_v7 = vld [vmem:[%s4034_s2 + $0xf0] sm:$0xff]  ;;  %v1120_v8 = vld [vmem:[%s4037_s5 + $0x40] sm:$0xff]  ;;  %v1119_v10 = vld [vmem:[%s4037_s5 + $0x38] sm:$0xff] }
  0x1f   :  { %v1118_v9 = vld [vmem:[%s4037_s5 + $0x30] sm:$0xff]  ;;  %v51_v11 = vld [vmem:[%s4034_s2 + $0x68] sm:$0xff]  ;;  %v69_v12 = vld [vmem:[%s4034_s2 + $0xf8] sm:$0xff] }
  0x20   :  { %v1117_v14 = vld [vmem:[%s4037_s5 + $0x28] sm:$0xff]  ;;  %v1115_v15 = vld [vmem:[%s4037_s5 + $0x18] sm:$0xff]  ;;  %v1116_v16 = vld [vmem:[%s4037_s5 + $0x20] sm:$0xff] }
  0x21   :  { %v52_v19 = vld [vmem:[%s4034_s2 + $0x70] sm:$0xff]  ;;  %v1112_v21 = vld [vmem:[%s4037_s5] sm:$0xff]  ;;  %v1113_v22 = vld [vmem:[%s4037_s5 + $0x8] sm:$0xff] }
  0x22   :  { %1774 = vmatmul.msk.f32.gmra.mxu0 %vm262_vm0, %v41_v23  ;;  %1792 = vmatmul.msk.f32.gmra.mxu3 %vm262_vm0, %v59_v24  ;;  %v1114_v20 = vld [vmem:[%s4037_s5 + $0x10] sm:$0xff]  ;;  %s2114_s5 = smov [#allocation4]  }
  0x23   :  { %154 = vperm.xlu0 %1858, %v80_v25   ;;  %s1753_s29 = sshll.u32 %s2114_s5, 4  ;;  %s1754_s29 = int_to_ptr.vmem [resolvable:$true] %s1753_s29 }
  0x24   :  { %224 = vperm.xlu1 %1859, %v94_v26   ;;  %149 = vperm.xlu2 %1860, %v79_v27   ;;  %v53_v26 = vld [vmem:[%s4034_s2 + $0x78] sm:$0xff]  ;;  %v1643_v27 = vld [vmem:[%s4039_s7] sm:$0xf] }
  0x2a   :  { %1775 = vmatmul.msk.f32.gmra.mxu0 %vm262_vm0, %v42_v28  ;;  %1793 = vmatmul.msk.f32.gmra.mxu3 %vm262_vm0, %v60_v29 }
  0x2b   :  { %219 = vperm.xlu0 %1858, %v93_v30  }
  0x2c   :  { %214 = vperm.xlu2 %1860, %v92_v31   ;;  %144 = vperm.xlu1 %1859, %v78_v32   ;;  %v54_v32 = vld [vmem:[%s4034_s2 + $0x80] sm:$0xff] }
  0x32   :  { %1776 = vmatmul.msk.f32.gmra.mxu0 %vm262_vm0, %v43_v33  ;;  %1794 = vmatmul.msk.f32.gmra.mxu3 %vm262_vm0, %v61_v34 }
  0x33   :  { %139 = vperm.xlu0 %1858, %v77_v35  }
  0x34   :  { %209 = vperm.xlu1 %1859, %v91_v36   ;;  %134 = vperm.xlu2 %1860, %v76_v37  }
  0x3a   :  { %1777 = vmatmul.msk.f32.gmra.mxu0 %vm262_vm0, %v44_v38  ;;  %1795 = vmatmul.msk.f32.gmra.mxu3 %vm262_vm0, %v62_v39  ;;  %v55_v38 = vld [vmem:[%s4034_s2 + $0x88] sm:$0xff]  ;;  %s1755_s2 = sshll.u32 %s4042_s10, 4  ;;  %s1756_s2 = int_to_ptr.hbm [resolvable:$true] %s1755_s2 }
  0x3b   :  { %204 = vperm.xlu0 %1858, %v90_v40  }
  0x3c   :  { %199 = vperm.xlu2 %1860, %v89_v41   ;;  %129 = vperm.xlu1 %1859, %v75_v42  }
  0x42   :  { %1778 = vmatmul.msk.f32.gmra.mxu0 %vm262_vm0, %v45_v43  ;;  %1796 = vmatmul.msk.f32.gmra.mxu3 %vm262_vm0, %v63_v44 }
  0x43   :  { %124 = vperm.xlu0 %1858, %v74_v45  }
  0x44   :  { %194 = vperm.xlu1 %1859, %v88_v46   ;;  %119 = vperm.xlu2 %1860, %v73_v47  }
  0x4a   :  { %1779 = vmatmul.msk.f32.gmra.mxu0 %vm262_vm0, %v46_v48  ;;  %1797 = vmatmul.msk.f32.gmra.mxu3 %vm262_vm0, %v64_v49 }
  0x4b   :  { %189 = vperm.xlu0 %1858, %v87_v50  }
  0x4c   :  { %184 = vperm.xlu2 %1860, %v86_v51   ;;  %114 = vperm.xlu1 %1859, %v72_v52  }
  0x52   :  { %1780 = vmatmul.msk.f32.gmra.mxu0 %vm262_vm0, %v47_v53  ;;  %1798 = vmatmul.msk.f32.gmra.mxu3 %vm262_vm0, %v65_v54 }
  0x53   :  { %109 = vperm.xlu0 %1858, %v71_v55  }
  0x54   :  { %1205 = vperm.xlu2 %1860, %v1127_v56   ;;  %104 = vperm.xlu1 %1859, %v70_v57  }
  0x5a   :  { %1781 = vmatmul.msk.f32.gmra.mxu0 %vm262_vm0, %v48_v58  ;;  %1799 = vmatmul.msk.f32.gmra.mxu3 %vm262_vm0, %v66_v59 }
  0x5b   :  { %1200 = vperm.xlu0 %1858, %v1126_v60  }
  0x5c   :  { %1190 = vperm.xlu2 %1860, %v1124_v61   ;;  %1195 = vperm.xlu1 %1859, %v1125_v62  }
  0x5e   :  { %v2378_v63 = vpop.permute.xlu2 %174 }
  0x62   :  { %1782 = vmatmul.msk.f32.gmra.mxu0 %vm262_vm0, %v49_v0  ;;  %1800 = vmatmul.msk.f32.gmra.mxu3 %vm262_vm0, %v67_v1 }
  0x63   :  { %1185 = vperm.xlu0 %1858, %v1123_v2  }
  0x64   :  { %1175 = vperm.xlu2 %1860, %v1121_v3   ;;  %1180 = vperm.xlu1 %1859, %v1122_v4  }
  0x66   :  { %v2397_v5 = vpop.permute.xlu2 %244 }
  0x6a   :  { %1783 = vmatmul.msk.f32.gmra.mxu0 %vm262_vm0, %v50_v6  ;;  %1801 = vmatmul.msk.f32.gmra.mxu3 %vm262_vm0, %v68_v7 }
  0x6b   :  { %1170 = vperm.xlu0 %1858, %v1120_v8  }
  0x6c   :  { %1160 = vperm.xlu2 %1860, %v1118_v9   ;;  %1165 = vperm.xlu1 %1859, %v1119_v10  }
  0x6e   :  { %v2422_v13 = vpop.permute.xlu2 %164 }
  0x72   :  { %1784 = vmatmul.msk.f32.gmra.mxu0 %vm262_vm0, %v51_v11  ;;  %1802 = vmatmul.msk.f32.gmra.mxu3 %vm262_vm0, %v69_v12 }
  0x73   :  { %1155 = vperm.xlu0 %1858, %v1117_v14  }
  0x74   :  { %1145 = vperm.xlu2 %1860, %v1115_v15   ;;  %1150 = vperm.xlu1 %1859, %v1116_v16  }
  0x75   :  { %v2435_v17 = vpop.permute.xlu0 %259 }
  0x76   :  { %v2437_v18 = vpop.permute.xlu1 %179  ;;  %v2451_v23 = vpop.permute.xlu2 %229 }
  0x7a   :  { %1785 = vmatmul.msk.f32.gmra.mxu0 %vm262_vm0, %v52_v19 }
  0x7b   :  { %1140 = vperm.xlu0 %1858, %v1114_v20  }
  0x7c   :  { %1130 = vperm.xlu2 %1860, %v1112_v21   ;;  %1135 = vperm.xlu1 %1859, %v1113_v22  }
  0x7d   :  { %v2454_v24 = vpop.permute.xlu0 %254 }
  0x7e   :  { %v2456_v25 = vpop.permute.xlu1 %249  ;;  %v2465_v28 = vpop.permute.xlu2 %149 }
  0x82   :  { %1786 = vmatmul.msk.f32.gmra.mxu0 %vm262_vm0, %v53_v26 }
  0x83   :  { %1646 = vperm.xlu0 %1858, %v1643_v27  }
  0x85   :  { %v2467_v29 = vpop.permute.xlu0 %169 }
  0x86   :  { %v2469_v30 = vpop.permute.xlu1 %239  ;;  %v215_v35 = vpop.permute.xlu2 %214 }
  0x87   :  { %v2471_v31 = vpop.f32.mrf.mxu0 }
  0x8a   :  { %1787 = vmatmul.msk.f32.gmra.mxu0 %vm262_vm0, %v54_v32 }
  0x8d   :  { %v430_v33 = vpop.f32.mrf.mxu3  ;;  %v2477_v34 = vpop.permute.xlu0 %234 }
  0x8e   :  { %v2479_v36 = vpop.permute.xlu1 %159  ;;  %v135_v43 = vpop.permute.xlu2 %134 }
  0x8f   :  { %v2481_v37 = vpop.f32.mrf.mxu0 }
  0x92   :  { %1788 = vmatmul.msk.f32.gmra.mxu0 %vm262_vm0, %v55_v38 }
  0x95   :  { %v433_v39 = vpop.f32.mrf.mxu3  ;;  %v2487_v40 = vpop.permute.xlu0 %154 }
  0x96   :  { %v225_v41 = vpop.permute.xlu1 %224  ;;  %v200_v48 = vpop.permute.xlu2 %199 }
  0x97   :  { %v2489_v42 = vpop.f32.mrf.mxu0  ;;  %v434_v60 = vadd.f32 %v433_v39, %v200_v48 }
  0x99   :  { %v1822_v1 = vmul.f32 -1.442695, %v434_v60 }
  0x9d   :  { %v436_v44 = vpop.f32.mrf.mxu3  ;;  %v220_v45 = vpop.permute.xlu0 %219 }
  0x9e   :  { %v2491_v46 = vpop.permute.xlu1 %144  ;;  %v120_v54 = vpop.permute.xlu2 %119 }
  0x9f   :  { %v385_v47 = vpop.f32.mrf.mxu0 }
  0xa0   :  { %v386_v62 = vadd.f32 %v385_v47, %v120_v54 }
  0xa2   :  { %v1806_v2 = vmul.f32 -1.442695, %v386_v62 }
  0xa5   :  { %v439_v49 = vpop.f32.mrf.mxu3  ;;  %v2493_v50 = vpop.permute.xlu0 %139 }
  0xa6   :  { %v210_v51 = vpop.permute.xlu1 %209 }
  0xa7   :  { %v388_v52 = vpop.f32.mrf.mxu0  ;;  %v440_v53 = vadd.f32 %v439_v49, %v210_v51 }
  0xa9   :  { %v1824_v55 = vmul.f32 -1.442695, %v440_v53 }
  0xab   :  { %1862 = vpow2.f32 %v1824_v55 }
  0xad   :  { %v442_v56 = vpop.f32.mrf.mxu3  ;;  %v205_v57 = vpop.permute.xlu0 %204 }
  0xae   :  { %v443_v58 = vadd.f32 %v442_v56, %v215_v35  ;;  %v130_v59 = vpop.permute.xlu1 %129  ;;  %v437_v3 = vadd.f32 %v436_v44, %v205_v57 }
  0xaf   :  { %v391_v61 = vpop.f32.mrf.mxu0 }
  0xb0   :  { %v1825_v0 = vmul.f32 -1.442695, %v443_v58  ;;  %v392_v10 = vadd.f32 %v391_v61, %v130_v59  ;;  %v1823_v15 = vmul.f32 -1.442695, %v437_v3 }
  0xb1   :  { %v1863_v9 = vpop.eup %1862 }
  0xb2   :  { %1864 = vpow2.f32 %v1825_v0  ;;  %v2495_v19 = vadd.f32 1.0, %v1863_v9  ;;  %v1808_v20 = vmul.f32 -1.442695, %v392_v10 }
  0xb3   :  { %1866 = vpow2.f32 %v1822_v1 }
  0xb4   :  { %1868 = vpow2.f32 %v1806_v2  ;;  %vm920_vm1 = vweird.f32 %v2495_v19 }
  0xb5   :  { %v445_v4 = vpop.f32.mrf.mxu3  ;;  %v125_v6 = vpop.permute.xlu0 %124 }
  0xb6   :  { %v446_v7 = vadd.f32 %v445_v4, %v220_v45  ;;  %v195_v8 = vpop.permute.xlu1 %194  ;;  %v389_v38 = vadd.f32 %v388_v52, %v125_v6 }
  0xb7   :  { %v394_v11 = vpop.f32.mrf.mxu0  ;;  %v431_v16 = vadd.f32 %v430_v33, %v195_v8 }
  0xb8   :  { %v1826_v12 = vmul.f32 -1.442695, %v446_v7  ;;  %v1865_v14 = vpop.eup %1864  ;;  %v395_v33 = vadd.f32 %v394_v11, %v135_v43  ;;  %v1807_v54 = vmul.f32 -1.442695, %v389_v38 }
  0xb9   :  { %v2497_v21 = vadd.f32 1.0, %v1865_v14  ;;  %v1867_v22 = vpop.eup %1866  ;;  %v1821_v26 = vmul.f32 -1.442695, %v431_v16 }
  0xba   :  { %1870 = vpow2.f32 %v1826_v12  ;;  %v1869_v35 = vpop.eup %1868  ;;  %v2502_v47 = vadd.f32 1.0, %v1867_v22  ;;  %v1809_v52 = vmul.f32 -1.442695, %v395_v33 }
  0xbb   :  { %1872 = vpow2.f32 %v1823_v15  ;;  %v2505_v51 = vadd.f32 1.0, %v1869_v35  ;;  %v941_v10 = vand.u32 2147483648, %v2497_v21  ;;  %v939_v38 = vand.u32 2147483647, %v2497_v21 }
  0xbc   :  { %1874 = vrcp.f32 %v2495_v19  ;;  %vm935_vm3 = vweird.f32 %v2497_v21 }
  0xbd   :  { %v448_v27 = vpop.f32.mrf.mxu3  ;;  %v2499_v32 = vpop.permute.xlu0 %189  ;;  %1876 = vpow2.f32 %v1808_v20  ;;  %4058 = vst [vmem:[#allocation8_spill] sm:$0xff] %v2505_v51  ;;  %v924_v20 = vand.u32 2147483647, %v2495_v19  ;;  %vm2591_vm7 = vcmp.eq.f32.partialorder %v939_v38, 8.507059e+37 }
  0xbe   :  { %v449_v39 = vadd.f32 %v448_v27, %v225_v41  ;;  %v115_v44 = vpop.permute.xlu1 %114  ;;  %1878 = vrcp.f32 %v2497_v21 }
  0xbf   :  { %v397_v45 = vpop.f32.mrf.mxu0  ;;  %1880 = vpow2.f32 %v1821_v26  ;;  %v383_v53 = vadd.f32 %v2489_v42, %v115_v44  ;;  %vm2578_vm4 = vcmp.eq.f32.partialorder %v924_v20, 8.507059e+37 }
  0xc0   :  { %v1827_v48 = vmul.f32 -1.442695, %v449_v39  ;;  %v1871_v49 = vpop.eup %1870  ;;  %v398_v58 = vadd.f32 %v397_v45, %v2493_v50 }
  0xc1   :  { %v1873_v55 = vpop.eup %1872  ;;  %v2511_v43 = vadd.f32 1.0, %v1871_v49  ;;  %v1805_v57 = vmul.f32 -1.442695, %v383_v53 }
  0xc2   :  { %1882 = vpow2.f32 %v1827_v48  ;;  %v2508_v41 = vpop.eup %1874  ;;  %v2518_v0 = vadd.f32 1.0, %v1873_v55  ;;  %v1810_v6 = vmul.f32 -1.442695, %v398_v58 }
  0xc3   :  { %1884 = vrcp.f32 %v2502_v47  ;;  %v1877_v56 = vpop.eup %1876  ;;  %v916_v2 = vmul.f32 %v2508_v41, %v2495_v19  ;;  %vm921_vm2 = vweird.f32 %v2508_v41  ;;  %vm950_vm6 = vweird.f32 %v2511_v43 }
  0xc4   :  { %1886 = vrcp.f32 %v2505_v51  ;;  %v2515_v60 = vpop.eup %1878  ;;  %v2522_v4 = vadd.f32 1.0, %v1877_v56  ;;  %vm2606_vm8 = vmor %vm920_vm1, %vm921_vm2  ;;  %vm905_vm12 = vweird.f32 %v2518_v0 }
  0xc5   :  { %v451_v59 = vpop.f32.mrf.mxu3  ;;  %1888 = vpow2.f32 %v1807_v54  ;;  %v110_v61 = vpop.permute.xlu0 %109  ;;  %v931_v14 = vmul.f32 %v2515_v60, %v2497_v21  ;;  %v917_v15 = vsub.f32 1.0, %v916_v2  ;;  %v911_v54 = vand.u32 2147483648, %v2518_v0 }
  0xc6   :  { %v452_v42 = vadd.f32 %v451_v59, %v2451_v23  ;;  %v1881_v62 = vpop.eup %1880  ;;  %1890 = vpow2.f32 %v1809_v52  ;;  %v380_v7 = vadd.f32 %v2481_v37, %v110_v61  ;;  %v926_v23 = vand.u32 2147483648, %v2495_v19  ;;  %v105_v27 = vpop.permute.xlu1 %104 }
  0xc7   :  { %v400_v1 = vpop.f32.mrf.mxu0  ;;  %1892 = vrcp.f32 %v2511_v43  ;;  %v2535_v12 = vadd.f32 1.0, %v1881_v62  ;;  %v932_v49 = vsub.f32 1.0, %v931_v14  ;;  %v918_v53 = vmul.f32 %v2508_v41, %v917_v15 }
  0xc8   :  { %v1883_v3 = vpop.eup %1882  ;;  %v1828_v50 = vmul.f32 -1.442695, %v452_v42  ;;  %1894 = vpow2.f32 %v1805_v57  ;;  %v401_v16 = vadd.f32 %v400_v1, %v2491_v46  ;;  %v1804_v26 = vmul.f32 -1.442695, %v380_v7 }
  0xc9   :  { %v2527_v8 = vpop.eup %1884  ;;  %v2529_v9 = vadd.f32 1.0, %v1883_v3  ;;  %v2544_v39 = vor.u32 1.1754944e-38, %v926_v23  ;;  %v2550_v46 = vor.u32 1.1754944e-38, %v941_v10  ;;  %v956_v2 = vand.u32 2147483648, %v2511_v43 }
  0xca   :  { %1896 = vpow2.f32 %v1828_v50  ;;  %v2532_v11 = vpop.eup %1886  ;;  %v1811_v56 = vmul.f32 -1.442695, %v401_v16  ;;  %vm936_vm5 = vweird.f32 %v2515_v60  ;;  %v2585_v14 = vor.u32 1.1754944e-38, %v911_v54 }
  0xcb   :  { %4059 = vst [vmem:[#allocation9_spill] sm:$0xff] %v2532_v11  ;;  %1898 = vrcp.f32 %v2518_v0  ;;  %v1889_v37 = vpop.eup %1888  ;;  %vm2631_vm10 = vmor %vm935_vm3, %vm936_vm5  ;;  %vm965_vm11 = vweird.f32 %v2529_v9  ;;  %v886_v7 = vmul.f32 %v2527_v8, %v2502_v47  ;;  %vm890_vm5 = vweird.f32 %v2502_v47 }
  0xcc   :  { %1900 = vrcp.f32 %v2522_v4  ;;  %v1891_v22 = vpop.eup %1890  ;;  %v2557_v52 = vadd.f32 1.0, %v1889_v37 }
  0xcd   :  { %1902 = vpow2.f32 %v1810_v6  ;;  %v454_v35 = vpop.f32.mrf.mxu3  ;;  %v2546_v44 = vpop.eup %1892  ;;  %v2569_v1 = vadd.f32 1.0, %v1891_v22  ;;  %v933_v6 = vmul.f32 %v2515_v60, %v932_v49 }
  0xce   :  { %1904 = vrcp.f32 %v2529_v9  ;;  %v455_v33 = vadd.f32 %v454_v35, %v2477_v34  ;;  %v1895_v45 = vpop.eup %1894  ;;  %4060 = vst [vmem:[#allocation10_spill] sm:$0xff] %v2557_v52  ;;  %v377_v34 = vadd.f32 %v2471_v31, %v105_v27  ;;  %v946_v61 = vmul.f32 %v2546_v44, %v2511_v43 }
  0xcf   :  { %1906 = vrcp.f32 %v2535_v12  ;;  %v403_v48 = vpop.f32.mrf.mxu0  ;;  %v909_v31 = vand.u32 2147483647, %v2518_v0  ;;  %v2573_v50 = vadd.f32 1.0, %v1895_v45  ;;  %v954_v35 = vand.u32 2147483647, %v2511_v43 }
  0xd0   :  { %v1897_v55 = vpop.eup %1896  ;;  %v1829_v57 = vmul.f32 -1.442695, %v455_v33  ;;  %1908 = vpow2.f32 %v1804_v26  ;;  %v404_v42 = vadd.f32 %v403_v48, %v2465_v28  ;;  %v919_v28 = vadd.f32 %v2508_v41, %v918_v53 }
  0xd1   :  { %v2560_v58 = vpop.eup %1898  ;;  %v2562_v59 = vadd.f32 1.0, %v1897_v55  ;;  %4061 = vst [vmem:[#allocation11_spill] sm:$0xff] %v2573_v50  ;;  %v1803_v10 = vmul.f32 -1.442695, %v377_v34  ;;  %v947_v22 = vsub.f32 1.0, %v946_v61  ;;  %v2600_v33 = vor.u32 1.1754944e-38, %v956_v2 }
  0xd2   :  { %v2567_v62 = vpop.eup %1900  ;;  %1910 = vpow2.f32 %v1829_v57  ;;  %v1812_v37 = vmul.f32 -1.442695, %v404_v42  ;;  %v901_v26 = vmul.f32 %v2560_v58, %v2518_v0  ;;  %v923_v53 = vsel %vm2606_vm8, %v2508_v41, %v919_v28 }
  0xd3   :  { %v1903_v3 = vpop.eup %1902  ;;  %1912 = vrcp.f32 %v2562_v59  ;;  %v948_v42 = vmul.f32 %v2546_v44, %v947_v22  ;;  %v971_v41 = vand.u32 2147483648, %v2529_v9  ;;  %vm951_vm9 = vweird.f32 %v2546_v44 }
  0xd4   :  { %v2582_v23 = vpop.eup %1904  ;;  %1914 = vpow2.f32 %v1811_v56  ;;  %v2617_v55 = vadd.f32 1.0, %v1903_v3  ;;  %v902_v61 = vsub.f32 1.0, %v901_v26  ;;  %vm2650_vm13 = vcmp.eq.f32.partialorder %v954_v35, 8.507059e+37  ;;  %vm2686_vm15 = vmor %vm950_vm6, %vm951_vm9 }
  0xd5   :  { %v2587_v15 = vpop.eup %1906  ;;  %1916 = vrcp.f32 %v2557_v52  ;;  %v457_v16 = vpop.f32.mrf.mxu3  ;;  %v961_v49 = vmul.f32 %v2582_v23, %v2529_v9  ;;  %vm906_vm14 = vweird.f32 %v2560_v58  ;;  %vm2692_vm0 = vcmp.eq.f32.partialorder %v909_v31, 8.507059e+37 }
  0xd6   :  { %1918 = vrcp.f32 %v2569_v1  ;;  %v458_v27 = vadd.f32 %v457_v16, %v2469_v30  ;;  %v1909_v45 = vpop.eup %1908  ;;  %v934_v30 = vadd.f32 %v2515_v60, %v933_v6  ;;  %vm966_vm2 = vweird.f32 %v2582_v23  ;;  %v185_v52 = vpop.permute.xlu2 %184 }
  0xd7   :  { %1920 = vrcp.f32 %v2573_v50  ;;  %v406_v48 = vpop.f32.mrf.mxu0  ;;  %v962_v28 = vsub.f32 1.0, %v961_v49  ;;  %v2646_v16 = vadd.f32 1.0, %v1909_v45  ;;  %v903_v49 = vmul.f32 %v2560_v58, %v902_v61 }
  0xd8   :  { %v1911_v54 = vpop.eup %1910  ;;  %1922 = vpow2.f32 %v1803_v10  ;;  %v1830_v19 = vmul.f32 -1.442695, %v458_v27  ;;  %v407_v34 = vadd.f32 %v406_v48, %v2487_v40  ;;  %v969_v10 = vand.u32 2147483647, %v2529_v9 }
  0xd9   :  { %v2620_v56 = vpop.eup %1912  ;;  %v2622_v57 = vadd.f32 1.0, %v1911_v54  ;;  %1924 = vpow2.f32 %v1812_v37  ;;  %v938_v37 = vsel %vm2631_vm10, %v2515_v60, %v934_v30  ;;  %4071 = vst [vmem:[#allocation13_spill] sm:$0xff] %v2646_v16  ;;  %v2657_v27 = vsel %vm2578_vm4, %v2544_v39, %v923_v53  ;;  %vm2726_vm4 = vmor %vm905_vm12, %vm906_vm14 }
  0xda   :  { %v1915_v2 = vpop.eup %1914  ;;  %1926 = vpow2.f32 %v1830_v19  ;;  %v1813_v6 = vmul.f32 -1.442695, %v407_v34  ;;  %v976_v22 = vmul.f32 %v2620_v56, %v2562_v59  ;;  %4074 = vst [vmem:[#allocation14_spill] sm:$0xff] %v2657_v27  ;;  %v949_v48 = vadd.f32 %v2546_v44, %v948_v42 }
  0xdb   :  { %v2635_v3 = vpop.eup %1916  ;;  %1928 = vrcp.f32 %v2622_v57  ;;  %v2662_v38 = vadd.f32 1.0, %v1915_v2  ;;  %v2667_v54 = vor.u32 1.1754944e-38, %v971_v41  ;;  %v2672_v39 = vsel %vm2591_vm7, %v2550_v46, %v938_v37  ;;  %vm2753_vm7 = vmor %vm965_vm11, %vm966_vm2 }
  0xdc   :  { %4070 = vst [vmem:[#allocation12_spill] sm:$0xff] %v2635_v3  ;;  %v2644_v21 = vpop.eup %1918  ;;  %1930 = vpow2.f32 %v1813_v6  ;;  %v984_v34 = vand.u32 2147483647, %v2562_v59  ;;  %v986_v42 = vand.u32 2147483648, %v2562_v59  ;;  %v963_v61 = vmul.f32 %v2582_v23, %v962_v28 }
  0xdd   :  { %v2659_v60 = vpop.eup %1920  ;;  %1932 = vrcp.f32 %v2617_v55  ;;  %v460_v45 = vpop.f32.mrf.mxu3  ;;  %4076 = vst [vmem:[#allocation16_spill] sm:$0xff] %v2672_v39  ;;  %v977_v20 = vsub.f32 1.0, %v976_v22  ;;  %v953_v43 = vsel %vm2686_vm15, %v2546_v44, %v949_v48  ;;  %v904_v28 = vadd.f32 %v2560_v58, %v903_v49 }
  0xde   :  { %4075 = vst [vmem:[#allocation15_spill] sm:$0xff] %v2659_v60  ;;  %v1923_v35 = vpop.eup %1922  ;;  %v461_v30 = vadd.f32 %v460_v45, %v2397_v5  ;;  %1934 = vrcp.f32 %v2646_v16  ;;  %vm2707_vm1 = vcmp.eq.f32.partialorder %v969_v10, 8.507059e+37  ;;  %v964_v44 = vadd.f32 %v2582_v23, %v963_v61  ;;  %v4192_v45 = vld [vmem:[#allocation11_spill] sm:$0xff] }
  0xdf   :  { %v1925_v53 = vpop.eup %1924  ;;  %v409_v19 = vpop.f32.mrf.mxu0  ;;  %1936 = vrcp.f32 %v2662_v38  ;;  %v2705_v22 = vadd.f32 1.0, %v1923_v35  ;;  %v978_v10 = vmul.f32 %v2620_v56, %v977_v20  ;;  %vm980_vm3 = vweird.f32 %v2562_v59 }
  0xe0   :  { %v1927_v5 = vpop.eup %1926  ;;  %v1831_v2 = vmul.f32 -1.442695, %v461_v30  ;;  %v410_v46 = vadd.f32 %v409_v19, %v2479_v36  ;;  %v887_v30 = vsub.f32 1.0, %v886_v7  ;;  %v2736_v61 = vsel %vm2650_vm13, %v2600_v33, %v953_v43 }
  0xe1   :  { %v2696_v40 = vpop.eup %1928  ;;  %v2699_v36 = vadd.f32 1.0, %v1927_v5  ;;  %4081 = vst [vmem:[#allocation17_spill] sm:$0xff] %v2705_v22  ;;  %v2713_v5 = vadd.f32 1.0, %v1925_v53  ;;  %v987_v53 = vor.u32 1.1754944e-38, %v986_v42  ;;  %vm2745_vm6 = vcmp.eq.f32.partialorder %v984_v34, 8.507059e+37 }
  0xe2   :  { %v1931_v37 = vpop.eup %1930  ;;  %1938 = vpow2.f32 %v1831_v2  ;;  %v1814_v31 = vmul.f32 -1.442695, %v410_v46  ;;  %v991_v48 = vmul.f32 %v2696_v40, %v2622_v57  ;;  %4086 = vst [vmem:[#allocation18_spill] sm:$0xff] %v2736_v61  ;;  %v908_v2 = vsel %vm2726_vm4, %v2560_v58, %v904_v28 }
  0xe3   :  { %v2711_v19 = vpop.eup %1932  ;;  %1940 = vrcp.f32 %v2699_v36  ;;  %v2731_v35 = vadd.f32 1.0, %v1931_v37  ;;  %v888_v58 = vmul.f32 %v2527_v8, %v887_v30  ;;  %vm891_vm8 = vweird.f32 %v2527_v8 }
  0xe4   :  { %1942 = vpow2.f32 %v1814_v31  ;;  %v2741_v0 = vpop.eup %1934  ;;  %v1001_v34 = vand.u32 2147483648, %v2622_v57  ;;  %vm981_vm9 = vweird.f32 %v2620_v56  ;;  %v968_v9 = vsel %vm2753_vm7, %v2582_v23, %v964_v44  ;;  %vm2818_vm12 = vmor %vm890_vm5, %vm891_vm8 }
  0xe5   :  { %v463_v7 = vpop.f32.mrf.mxu3  ;;  %4087 = vst [vmem:[#allocation19_spill] sm:$0xff] %v2741_v0  ;;  %1944 = vrcp.f32 %v2705_v22  ;;  %v2759_v26 = vpop.eup %1936  ;;  %v992_v28 = vsub.f32 1.0, %v991_v48  ;;  %v979_v37 = vadd.f32 %v2620_v56, %v978_v10  ;;  %v999_v49 = vand.u32 2147483647, %v2622_v57  ;;  %vm2792_vm11 = vmor %vm980_vm3, %vm981_vm9 }
  0xe6   :  { %v464_v46 = vadd.f32 %v463_v7, %v2456_v25  ;;  %1946 = vrcp.f32 %v2713_v5  ;;  %v2778_v7 = vsel %vm2692_vm0, %v2585_v14, %v908_v2  ;;  %v2782_v48 = vadd.f32 %v2527_v8, %v888_v58 }
  0xe7   :  { %v412_v25 = vpop.f32.mrf.mxu0  ;;  %1948 = vrcp.f32 %v2731_v35  ;;  %4092 = vst [vmem:[#allocation20_spill] sm:$0xff] %v2778_v7  ;;  %vm995_vm10 = vweird.f32 %v2622_v57  ;;  %v2799_v41 = vsel %vm2707_vm1, %v2667_v54, %v968_v9  ;;  %v1002_v33 = vor.u32 1.1754944e-38, %v1001_v34 }
  0xe8   :  { %v1939_v42 = vpop.eup %1938  ;;  %v1832_v6 = vmul.f32 -1.442695, %v464_v46  ;;  %v413_v43 = vadd.f32 %v412_v25, %v2422_v13  ;;  %v746_v13 = vand.u32 2147483648, %v2713_v5  ;;  %v993_v46 = vmul.f32 %v2696_v40, %v992_v28 }
  0xe9   :  { %v2769_v31 = vpop.eup %1940  ;;  %v2772_v30 = vadd.f32 1.0, %v1939_v42  ;;  %v983_v58 = vsel %vm2792_vm11, %v2620_v56, %v979_v37  ;;  %v721_v54 = vmul.f32 %v2759_v26, %v2662_v38  ;;  %v1016_v9 = vand.u32 2147483648, %v2699_v36 }
  0xea   :  { %v1943_v23 = vpop.eup %1942  ;;  %1950 = vpow2.f32 %v1832_v6  ;;  %v1815_v44 = vmul.f32 -1.442695, %v413_v43  ;;  %v1006_v10 = vmul.f32 %v2769_v31, %v2699_v36  ;;  %vm2825_vm13 = vcmp.eq.f32.partialorder %v999_v49, 8.507059e+37 }
  0xeb   :  { %1952 = vrcp.f32 %v2772_v30  ;;  %v2801_v2 = vpop.eup %1944  ;;  %v2809_v25 = vadd.f32 1.0, %v1943_v23  ;;  %v2829_v28 = vor.u32 1.1754944e-38, %v746_v13  ;;  %v1014_v56 = vand.u32 2147483647, %v2699_v36 }
  0xec   :  { %4095 = vst [vmem:[#allocation21_spill] sm:$0xff] %v2801_v2  ;;  %1954 = vpow2.f32 %v1815_v44  ;;  %v2807_v59 = vpop.eup %1946  ;;  %v1007_v14 = vsub.f32 1.0, %v1006_v10  ;;  %vm996_vm14 = vweird.f32 %v2696_v40  ;;  %v994_v6 = vadd.f32 %v2696_v40, %v993_v46 }
  0xed   :  { %v466_v42 = vpop.f32.mrf.mxu3  ;;  %v2835_v23 = vpop.eup %1948  ;;  %v761_v37 = vand.u32 2147483648, %v2731_v35  ;;  %1956 = vrcp.f32 %v2809_v25  ;;  %vm1010_vm15 = vweird.f32 %v2699_v36  ;;  %v722_v20 = vsub.f32 1.0, %v721_v54  ;;  %vm2867_vm0 = vmor %vm995_vm10, %vm996_vm14 }
  0xee   :  { %v467_v34 = vadd.f32 %v466_v42, %v2454_v24  ;;  %v2841_v24 = vsel %vm2745_vm6, %v987_v53, %v983_v58  ;;  %v736_v53 = vmul.f32 %v2807_v59, %v2713_v5  ;;  %v2856_v46 = vor.u32 1.1754944e-38, %v1016_v9 }
  0xef   :  { %v415_v44 = vpop.f32.mrf.mxu0  ;;  %v1008_v22 = vmul.f32 %v2769_v31, %v1007_v14  ;;  %v998_v9 = vsel %vm2867_vm0, %v2696_v40, %v994_v6  ;;  %v2877_v0 = vor.u32 1.1754944e-38, %v761_v37  ;;  %v2880_v57 = vmul.f32 %v2759_v26, %v722_v20 }
  0xf0   :  { %v1951_v49 = vpop.eup %1950  ;;  %v1833_v13 = vmul.f32 -1.442695, %v467_v34  ;;  %v416_v42 = vadd.f32 %v415_v44, %v2467_v29  ;;  %v737_v16 = vsub.f32 1.0, %v736_v53  ;;  %v1029_v54 = vand.u32 2147483647, %v2772_v30 }
  0xf1   :  { %v2846_v2 = vpop.eup %1952  ;;  %v2849_v10 = vadd.f32 1.0, %v1951_v49  ;;  %v1031_v49 = vand.u32 2147483648, %v2772_v30  ;;  %vm1011_vm1 = vweird.f32 %v2769_v31  ;;  %vm2886_vm2 = vcmp.eq.f32.partialorder %v1014_v56, 8.507059e+37 }
  0xf2   :  { %v1955_v58 = vpop.eup %1954  ;;  %1958 = vpow2.f32 %v1833_v13  ;;  %v1816_v34 = vmul.f32 -1.442695, %v416_v42  ;;  %v1021_v29 = vmul.f32 %v2846_v2, %v2772_v30  ;;  %v751_v13 = vmul.f32 %v2835_v23, %v2731_v35  ;;  %vm2917_vm4 = vmor %vm1010_vm15, %vm1011_vm1 }
  0xf3   :  { %1960 = vrcp.f32 %v2849_v10  ;;  %v2859_v44 = vadd.f32 1.0, %v1955_v58  ;;  %v759_v42 = vand.u32 2147483647, %v2731_v35  ;;  %v2890_v6 = vpop.eup %1956  ;;  %vm1025_vm3 = vweird.f32 %v2772_v30 }
  0xf4   :  { %1962 = vpow2.f32 %v1816_v34  ;;  %v1022_v14 = vsub.f32 1.0, %v1021_v29  ;;  %v2893_v53 = vor.u32 1.1754944e-38, %v1031_v49  ;;  %v1009_v20 = vadd.f32 %v2769_v31, %v1008_v22 }
  0xf5   :  { %v469_v58 = vpop.f32.mrf.mxu3  ;;  %1964 = vrcp.f32 %v2859_v44  ;;  %v776_v50 = vand.u32 2147483648, %v2809_v25  ;;  %v752_v11 = vsub.f32 1.0, %v751_v13  ;;  %v1044_v49 = vand.u32 2147483647, %v2849_v10 }
  0xf6   :  { %v470_v34 = vadd.f32 %v469_v58, %v2435_v17  ;;  %v2898_v17 = vsel %vm2825_vm13, %v1002_v33, %v998_v9  ;;  %v1023_v22 = vmul.f32 %v2846_v2, %v1022_v14  ;;  %v738_v33 = vmul.f32 %v2807_v59, %v737_v16 }
  0xf7   :  { %v418_v37 = vpop.f32.mrf.mxu0  ;;  %vm2924_vm5 = vcmp.eq.f32.partialorder %v1029_v54, 8.507059e+37  ;;  %vm755_vm6 = vweird.f32 %v2731_v35  ;;  %v753_v54 = vmul.f32 %v2835_v23, %v752_v11  ;;  %vm1026_vm7 = vweird.f32 %v2846_v2 }
  0xf8   :  { %v1959_v58 = vpop.eup %1958  ;;  %v1834_v56 = vmul.f32 -1.442695, %v470_v34  ;;  %v419_v60 = vadd.f32 %v418_v37, %v2378_v63  ;;  %v1046_v63 = vand.u32 2147483648, %v2849_v10  ;;  %v791_v37 = vand.u32 2147483648, %v2859_v44  ;;  %vm2972_vm13 = vmor %vm1025_vm3, %vm1026_vm7 }
  0xf9   :  { %v2903_v51 = vpop.eup %1960  ;;  %v2905_v7 = vadd.f32 1.0, %v1959_v58  ;;  %vm756_vm8 = vweird.f32 %v2835_v23  ;;  %vm1040_vm9 = vweird.f32 %v2849_v10  ;;  %vm2959_vm10 = vcmp.eq.f32.partialorder %v759_v42, 8.507059e+37 }
  0xfa   :  { %v1963_v43 = vpop.eup %1962  ;;  %1966 = vpow2.f32 %v1834_v56  ;;  %v1817_v9 = vmul.f32 -1.442695, %v419_v60  ;;  %v1036_v34 = vmul.f32 %v2903_v51, %v2849_v10  ;;  %v1013_v60 = vsel %vm2917_vm4, %v2769_v31, %v1009_v20  ;;  %vm3013_vm4 = vmor %vm755_vm6, %vm756_vm8 }
  0xfb   :  { %1968 = vrcp.f32 %v2905_v7  ;;  %v2922_v14 = vadd.f32 1.0, %v1963_v43  ;;  %v2933_v36 = vpop.eup %1964  ;;  %v766_v56 = vmul.f32 %v2890_v6, %v2809_v25  ;;  %v1024_v43 = vadd.f32 %v2846_v2, %v1023_v22 }
  0xfc   :  { %1970 = vpow2.f32 %v1817_v9  ;;  %v1037_v58 = vsub.f32 1.0, %v1036_v34  ;;  %v2944_v20 = vor.u32 1.1754944e-38, %v776_v50  ;;  %v2947_v9 = vadd.f32 %v2807_v59, %v738_v33 }
  0xfd   :  { %1972 = vrcp.f32 %v2922_v14  ;;  %v2949_v13 = vor.u32 1.1754944e-38, %v1046_v63  ;;  %v2954_v11 = vsel %vm2886_vm2, %v2856_v46, %v1013_v60  ;;  %v781_v22 = vmul.f32 %v2933_v36, %v2859_v44 }
  0xfe   :  { %v1038_v31 = vmul.f32 %v2903_v51, %v1037_v58  ;;  %vm2964_vm11 = vcmp.eq.f32.partialorder %v1044_v49, 8.507059e+37  ;;  %v2976_v40 = vor.u32 1.1754944e-38, %v791_v37  ;;  %v767_v42 = vsub.f32 1.0, %v766_v56 }
  0xff   :  { %v421_v34 = vpop.f32.mrf.mxu0  ;;  %vm771_vm14 = vweird.f32 %v2890_v6  ;;  %v754_v60 = vadd.f32 %v2835_v23, %v753_v54  ;;  %vm1041_vm15 = vweird.f32 %v2903_v51  ;;  %v1028_v30 = vsel %vm2972_vm13, %v2846_v2, %v1024_v43 }
 0x100   :  { %v1967_v50 = vpop.eup %1966  ;;  %v422_v33 = vadd.f32 %v421_v34, %v2437_v18  ;;  %v1061_v34 = vand.u32 2147483648, %v2905_v7  ;;  %vm741_vm0 = vweird.f32 %v2807_v59  ;;  %v1059_v54 = vand.u32 2147483647, %v2905_v7 }
 0x101   :  { %v2980_v18 = vpop.eup %1968  ;;  %v2982_v49 = vadd.f32 1.0, %v1967_v50  ;;  %v1039_v50 = vadd.f32 %v2903_v51, %v1038_v31  ;;  %vm770_vm1 = vweird.f32 %v2809_v25  ;;  %v806_v2 = vand.u32 2147483648, %v2922_v14 }
 0x102   :  { %v1971_v37 = vpop.eup %1970  ;;  %v1818_v56 = vmul.f32 -1.442695, %v422_v33  ;;  %v1051_v58 = vmul.f32 %v2980_v18, %v2905_v7  ;;  %v782_v43 = vsub.f32 1.0, %v781_v22  ;;  %vm740_vm2 = vweird.f32 %v2713_v5 }
 0x103   :  { %v2995_v27 = vpop.eup %1972  ;;  %1974 = vrcp.f32 %v2982_v49  ;;  %v2998_v3 = vadd.f32 1.0, %v1971_v37  ;;  %vm1055_vm3 = vweird.f32 %v2905_v7  ;;  %v3006_v31 = vsel %vm2924_vm5, %v2893_v53, %v1028_v30  ;;  %vm3024_vm5 = vmor %vm1040_vm9, %vm1041_vm15 }
 0x104   :  { %1976 = vpow2.f32 %v1818_v56  ;;  %v1052_v33 = vsub.f32 1.0, %v1051_v58  ;;  %v768_v46 = vmul.f32 %v2890_v6, %v767_v42  ;;  %v3018_v22 = vor.u32 1.1754944e-38, %v1061_v34  ;;  %vm3094_vm15 = vmor %vm770_vm1, %vm771_vm14 }
 0x105   :  { %1978 = vrcp.f32 %v2998_v3  ;;  %v804_v16 = vand.u32 2147483647, %v2922_v14  ;;  %v758_v35 = vsel %vm3013_vm4, %v2835_v23, %v754_v60  ;;  %v1074_v58 = vand.u32 2147483647, %v2982_v49  ;;  %vm3111_vm14 = vmor %vm740_vm2, %vm741_vm0 }
 0x106   :  { %v1053_v42 = vmul.f32 %v2980_v18, %v1052_v33  ;;  %v1043_v10 = vsel %vm3024_vm5, %v2903_v51, %v1039_v50  ;;  %v796_v34 = vmul.f32 %v2995_v27, %v2922_v14  ;;  %v4118_v30 = vand.u32 2147483647, %v2809_v25 }
 0x107   :  { %v424_v37 = vpop.f32.mrf.mxu0  ;;  %v1076_v23 = vand.u32 2147483648, %v2982_v49  ;;  %v3048_v60 = vor.u32 1.1754944e-38, %v806_v2  ;;  %v783_v33 = vmul.f32 %v2933_v36, %v782_v43  ;;  %vm786_vm9 = vweird.f32 %v2933_v36 }
 0x108   :  { %vm3042_vm6 = vcmp.eq.f32.partialorder %v4118_v30, 8.507059e+37  ;;  %v425_v51 = vadd.f32 %v424_v37, %v185_v52  ;;  %vm3052_vm13 = vcmp.eq.f32.partialorder %v1059_v54, 8.507059e+37  ;;  %v797_v53 = vsub.f32 1.0, %v796_v34 }
 0x109   :  { %v769_v30 = vadd.f32 %v2890_v6, %v768_v46  ;;  %v3060_v39 = vsel %vm2959_vm10, %v2877_v0, %v758_v35  ;;  %v1975_v61 = vpop.eup %1974  ;;  %vm1056_vm4 = vweird.f32 %v2980_v18  ;;  %v3067_v52 = vsel %vm2964_vm11, %v2949_v13, %v1043_v10 }
 0x10a   :  { %v821_v54 = vand.u32 2147483648, %v2998_v3  ;;  %v1977_v2 = vpop.eup %1976  ;;  %v1819_v43 = vmul.f32 -1.442695, %v425_v51  ;;  %v1066_v46 = vmul.f32 %v1975_v61, %v2982_v49  ;;  %vm3071_vm5 = vcmp.eq.f32.partialorder %v1074_v58, 8.507059e+37 }
 0x10b   :  { %v1054_v0 = vadd.f32 %v2980_v18, %v1053_v42  ;;  %v819_v35 = vand.u32 2147483647, %v2998_v3  ;;  %v4125_v34 = vand.u32 2147483647, %v2859_v44  ;;  %v3083_v13 = vpop.eup %1978  ;;  %v3085_v10 = vadd.f32 1.0, %v1977_v2 }
 0x10c   :  { %v1077_v37 = vor.u32 1.1754944e-38, %v1076_v23  ;;  %v798_v58 = vmul.f32 %v2995_v27, %v797_v53  ;;  %v784_v51 = vadd.f32 %v2933_v36, %v783_v33  ;;  %1980 = vpow2.f32 %v1819_v43  ;;  %v4171_v23 = vld [vmem:[#allocation16_spill] sm:$0xff] }
 0x10d   :  { %vm3079_vm10 = vcmp.eq.f32.partialorder %v4125_v34, 8.507059e+37  ;;  %v1067_v34 = vsub.f32 1.0, %v1066_v46  ;;  %v811_v2 = vmul.f32 %v3083_v13, %v2998_v3  ;;  %vm3100_vm8 = vcmp.eq.f32.partialorder %v804_v16, 8.507059e+37 }
 0x10e   :  { %v773_v33 = vsel %vm3094_vm15, %v2890_v6, %v769_v30  ;;  %v4134_v53 = vand.u32 2147483647, %v2713_v5  ;;  %1982 = vrcp.f32 %v3085_v10  ;;  %vm1071_vm7 = vweird.f32 %v1975_v61  ;;  %vm3127_vm15 = vmor %vm1055_vm3, %vm1056_vm4 }
 0x10f   :  { %v822_v16 = vor.u32 1.1754944e-38, %v821_v54  ;;  %vm801_vm0 = vweird.f32 %v2995_v27  ;;  %v1068_v5 = vmul.f32 %v1975_v61, %v1067_v34  ;;  %v1058_v30 = vsel %vm3127_vm15, %v2980_v18, %v1054_v0 }
 0x110   :  { %vm3117_vm1 = vcmp.eq.f32.partialorder %v4134_v53, 8.507059e+37  ;;  %v812_v46 = vsub.f32 1.0, %v811_v2  ;;  %v799_v42 = vadd.f32 %v2995_v27, %v798_v58  ;;  %vm4139_vm2 = vweird.f32 %v2859_v44  ;;  %v427_v53 = vpop.f32.mrf.mxu0 }
 0x111   :  { %vm3140_vm11 = vmor %vm4139_vm2, %vm786_vm9  ;;  %v834_v54 = vand.u32 2147483647, %v3085_v10  ;;  %vm3145_vm3 = vcmp.eq.f32.partialorder %v819_v35, 8.507059e+37  ;;  %v3155_v0 = vsel %vm3042_vm6, %v2944_v20, %v773_v33  ;;  %v743_v44 = vsel %vm3111_vm14, %v2807_v59, %v2947_v9 }
 0x112   :  { %v788_v18 = vsel %vm3140_vm11, %v2933_v36, %v784_v51  ;;  %v428_v58 = vadd.f32 %v427_v53, %v2499_v32  ;;  %v1069_v35 = vadd.f32 %v1975_v61, %v1068_v5  ;;  %v836_v2 = vand.u32 2147483648, %v3085_v10 }
 0x113   :  { %v813_v6 = vmul.f32 %v3083_v13, %v812_v46  ;;  %vm4144_vm9 = vweird.f32 %v2922_v14  ;;  %vm4147_vm6 = vweird.f32 %v2982_v49  ;;  %v1063_v32 = vsel %vm3052_vm13, %v3018_v22, %v1058_v30  ;;  %v1981_v14 = vpop.eup %1980 }
 0x114   :  { %vm3168_vm4 = vmor %vm4144_vm9, %vm801_vm0  ;;  %vm816_vm14 = vweird.f32 %v3083_v13  ;;  %v3181_v59 = vadd.f32 %v2759_v26, %v2880_v57  ;;  %vm726_vm15 = vweird.f32 %v2759_v26  ;;  %v1820_v20 = vmul.f32 -1.442695, %v428_v58  ;;  %v1983_v22 = vpop.eup %1982 }
 0x115   :  { %vm1072_vm11 = vmor %vm4147_vm6, %vm1071_vm7  ;;  %vm830_vm0 = vweird.f32 %v3085_v10  ;;  %v814_v49 = vadd.f32 %v3083_v13, %v813_v6  ;;  %v803_v56 = vsel %vm3168_vm4, %v2995_v27, %v799_v42  ;;  %v3194_v57 = vsel %vm3079_vm10, %v2976_v40, %v788_v18 }
 0x116   :  { %v1073_v9 = vsel %vm1072_vm11, %v1975_v61, %v1069_v35  ;;  %v729_v51 = vand.u32 2147483647, %v2662_v38  ;;  %v731_v61 = vand.u32 2147483648, %v2662_v38  ;;  %v3198_v33 = vadd.f32 1.0, %v1981_v14 }
 0x117   :  { %v1078_v50 = vsel %vm3071_vm5, %v1077_v37, %v1073_v9  ;;  %1984 = vpow2.f32 %v1820_v20  ;;  %v826_v25 = vmul.f32 %v1983_v22, %v3085_v10  ;;  %vm3201_vm7 = vcmp.eq.f32.partialorder %v834_v54, 8.507059e+37 }
 0x118   :  { %1273 = vmatpush.msra.mxu2 %v1078_v50  ;;  %v837_v29 = vor.u32 1.1754944e-38, %v836_v2  ;;  %vm4150_vm13 = vweird.f32 %v2998_v3  ;;  %v3219_v37 = vsel %vm3100_vm8, %v3048_v60, %v803_v56  ;;  %v3224_v5 = vsel %vm3117_vm1, %v2829_v28, %v743_v44 }
 0x119   :  { %vm3209_vm5 = vmor %vm4150_vm13, %vm816_vm14  ;;  %vm4153_vm10 = vweird.f32 %v2662_v38  ;;  %v827_v30 = vsub.f32 1.0, %v826_v25  ;;  %v4156_v28 = vand.u32 2147483647, %v2502_v47  ;;  %v706_v38 = vmul.f32 %v2711_v19, %v2617_v55 }
 0x11a   :  { %v818_v63 = vsel %vm3209_vm5, %v3083_v13, %v814_v49  ;;  %vm3230_vm2 = vmor %vm4153_vm10, %vm726_vm15  ;;  %v896_v13 = vand.u32 2147483648, %v2502_v47  ;;  %1274 = vmatpush.msra.mxu2 %v1063_v32  ;;  %vm831_vm1 = vweird.f32 %v1983_v22  ;;  %vm3247_vm9 = vcmp.eq.f32.partialorder %v729_v51, 8.507059e+37 }
 0x11b   :  { %v728_v60 = vsel %vm3230_vm2, %v2759_v26, %v3181_v59  ;;  %vm3241_vm8 = vcmp.eq.f32.partialorder %v4156_v28, 8.507059e+37  ;;  %v732_v46 = vor.u32 1.1754944e-38, %v731_v61  ;;  %v871_v42 = vmul.f32 %v2587_v15, %v2535_v12 }
 0x11c   :  { %1986 = vrcp.f32 %v3198_v33  ;;  %1275 = vmatpush.msra.mxu2 %v3067_v52  ;;  %v828_v47 = vmul.f32 %v1983_v22, %v827_v30  ;;  %v823_v26 = vsel %vm3145_vm3, %v822_v16, %v818_v63  ;;  %v707_v7 = vsub.f32 1.0, %v706_v38  ;;  %vm832_vm3 = vmor %vm830_vm0, %vm831_vm1 }
 0x11d   :  { %v897_v53 = vor.u32 1.1754944e-38, %v896_v13  ;;  %vm710_vm4 = vweird.f32 %v2617_v55  ;;  %vm711_vm6 = vweird.f32 %v2711_v19  ;;  %v872_v54 = vsub.f32 1.0, %v871_v42  ;;  %v1985_v18 = vpop.eup %1984 }
 0x11e   :  { %1276 = vmatpush.msra.mxu2 %v3006_v31  ;;  %v829_v44 = vadd.f32 %v1983_v22, %v828_v47  ;;  %v708_v58 = vmul.f32 %v2711_v19, %v707_v7  ;;  %v714_v35 = vand.u32 2147483647, %v2617_v55  ;;  %v716_v52 = vand.u32 2147483648, %v2617_v55  ;;  %vm3300_vm14 = vmor %vm710_vm4, %vm711_vm6  ;;  %v4174_v7 = vld [vmem:[#allocation10_spill] sm:$0xff] }
 0x11f   :  { %v3263_v2 = vadd.f32 1.0, %v1985_v18  ;;  %v873_v16 = vmul.f32 %v2587_v15, %v872_v54  ;;  %vm876_vm11 = vweird.f32 %v2587_v15  ;;  %v691_v31 = vmul.f32 %v2644_v21, %v2569_v1  ;;  %v4176_v54 = vld [vmem:[#allocation14_spill] sm:$0xff] }
 0x120   :  { %1277 = vmatpush.msra.mxu2 %v2954_v11  ;;  %v833_v34 = vsel %vm832_vm3, %v1983_v22, %v829_v44  ;;  %v709_v6 = vadd.f32 %v2711_v19, %v708_v58  ;;  %v879_v36 = vand.u32 2147483647, %v2535_v12  ;;  %v881_v32 = vand.u32 2147483648, %v2535_v12 }
 0x121   :  { %1988 = vrcp.f32 %v3263_v2  ;;  %v838_v10 = vsel %vm3201_vm7, %v837_v29, %v833_v34  ;;  %v874_v59 = vadd.f32 %v2587_v15, %v873_v16  ;;  %v692_v14 = vsub.f32 1.0, %v691_v31  ;;  %v4181_v31 = vld [vmem:[#allocation20_spill] sm:$0xff] }
 0x122   :  { %v3280_v20 = vpop.eup %1986  ;;  %1208 = vmatpush.msra.mxu1 %v838_v10  ;;  %1278 = vmatpush.msra.mxu2 %v2898_v17  ;;  %v3285_v11 = vsel %vm3247_vm9, %v732_v46, %v728_v60  ;;  %v4161_v9 = vsel %vm2818_vm12, %v2527_v8, %v2782_v48  ;;  %vm3304_vm15 = vcmp.eq.f32.partialorder %v714_v35, 8.507059e+37  ;;  %vm875_vm0 = vweird.f32 %v2535_v12 }
 0x123   :  { %v3294_v49 = vsel %vm3241_vm8, %v897_v53, %v4161_v9  ;;  %v713_v8 = vsel %vm3300_vm14, %v2711_v19, %v709_v6  ;;  %v717_v48 = vor.u32 1.1754944e-38, %v716_v52  ;;  %vm3314_vm12 = vmor %vm875_vm0, %vm876_vm11  ;;  %v693_v55 = vmul.f32 %v2644_v21, %v692_v14  ;;  %v4175_v53 = vld [vmem:[#allocation12_spill] sm:$0xff] }
 0x124   :  { %vm696_vm7 = vweird.f32 %v2644_v21  ;;  %1209 = vmatpush.msra.mxu1 %v823_v26  ;;  %1279 = vmatpush.msra.mxu2 %v2841_v24  ;;  %v878_v12 = vsel %vm3314_vm12, %v2587_v15, %v874_v59  ;;  %vm695_vm13 = vweird.f32 %v2569_v1  ;;  %v699_v19 = vand.u32 2147483647, %v2569_v1  ;;  %v1087_v59 = vld [vmem:[%s4036_s4 + $0x38] sm:$0xff] }
 0x125   :  { %v701_v22 = vand.u32 2147483648, %v2569_v1  ;;  %vm880_vm5 = vcmp.eq.f32.partialorder %v879_v36, 8.507059e+37  ;;  %v882_v50 = vor.u32 1.1754944e-38, %v881_v32  ;;  %v694_v51 = vadd.f32 %v2644_v21, %v693_v55  ;;  %vm3336_vm10 = vmor %vm695_vm13, %vm696_vm7  ;;  %v4182_v36 = vld [vmem:[#allocation8_spill] sm:$0xff]  ;;  %v4183_v32 = vld [vmem:[#allocation9_spill] sm:$0xff] }
 0x126   :  { %v676_v61 = vmul.f32 %v2567_v62, %v2522_v4  ;;  %1210 = vmatpush.msra.mxu1 %v3219_v37  ;;  %1280 = vmatpush.msra.mxu2 %v2799_v41  ;;  %v3334_v15 = vsel %vm3304_vm15, %v717_v48, %v713_v8  ;;  %vm860_vm2 = vweird.f32 %v3263_v2  ;;  %v864_v1 = vand.u32 2147483647, %v3263_v2  ;;  %v4170_v37 = vld [vmem:[#allocation18_spill] sm:$0xff]  ;;  %v4193_v55 = vld [vmem:[#allocation15_spill] sm:$0xff] }
 0x127   :  { %v866_v25 = vand.u32 2147483648, %v3263_v2  ;;  %v3343_v27 = vpop.eup %1988  ;;  %v883_v29 = vsel %vm880_vm5, %v882_v50, %v878_v12  ;;  %v698_v41 = vsel %vm3336_vm10, %v2644_v21, %v694_v51  ;;  %v841_v63 = vmul.f32 %v3280_v20, %v3198_v33  ;;  %v1094_v8 = vld [vmem:[%s4036_s4 + $0x70] sm:$0xff] }
 0x128   :  { %v677_v40 = vsub.f32 1.0, %v676_v61  ;;  %1211 = vmatpush.msra.mxu1 %v3194_v57  ;;  %1281 = vmatpush.msra.mxu2 %v4170_v37  ;;  %vm700_vm8 = vcmp.eq.f32.partialorder %v699_v19, 8.507059e+37  ;;  %v702_v3 = vor.u32 1.1754944e-38, %v701_v22  ;;  %v856_v13 = vmul.f32 %v3343_v27, %v3263_v2  ;;  %v3560_v19 = vpop.permute.xlu2 %1205 }
 0x129   :  { %v684_v30 = vand.u32 2147483647, %v2522_v4  ;;  %vm680_vm1 = vweird.f32 %v2522_v4  ;;  %v686_v21 = vand.u32 2147483648, %v2522_v4  ;;  %v842_v28 = vsub.f32 1.0, %v841_v63 }
 0x12a   :  { %v678_v60 = vmul.f32 %v2567_v62, %v677_v40  ;;  %1212 = vmatpush.msra.mxu1 %v3155_v0  ;;  %1282 = vmatpush.msra.mxu2 %v4171_v23  ;;  %v703_v57 = vsel %vm700_vm8, %v702_v3, %v698_v41  ;;  %v857_v38 = vsub.f32 1.0, %v856_v13  ;;  %vm3360_vm9 = vcmp.eq.f32.partialorder %v864_v1, 8.507059e+37  ;;  %v1081_v1 = vld [vmem:[%s4036_s4 + $0x8] sm:$0xff]  ;;  %v4199_v40 = vld [vmem:[#allocation19_spill] sm:$0xff] }
 0x12b   :  { %v867_v46 = vor.u32 1.1754944e-38, %v866_v25  ;;  %vm681_vm4 = vweird.f32 %v2567_v62  ;;  %v843_v47 = vmul.f32 %v3280_v20, %v842_v28  ;;  %v849_v26 = vand.u32 2147483647, %v3198_v33  ;;  %v4198_v41 = vld [vmem:[#allocation13_spill] sm:$0xff] }
 0x12c   :  { %v679_v42 = vadd.f32 %v2567_v62, %v678_v60  ;;  %v661_v0 = vmul.f32 %v4175_v53, %v4174_v7  ;;  %1213 = vmatpush.msra.mxu1 %v3060_v39  ;;  %1283 = vmatpush.msra.mxu2 %v4176_v54  ;;  %v858_v18 = vmul.f32 %v3343_v27, %v857_v38  ;;  %vm861_vm6 = vweird.f32 %v3343_v27  ;;  %vm3381_vm11 = vmor %vm680_vm1, %vm681_vm4  ;;  %v4201_v38 = vld [vmem:[#allocation21_spill] sm:$0xff] }
 0x12d   :  { %vm3374_vm3 = vcmp.eq.f32.partialorder %v684_v30, 8.507059e+37  ;;  %v851_v58 = vand.u32 2147483648, %v3198_v33  ;;  %v687_v52 = vor.u32 1.1754944e-38, %v686_v21  ;;  %v844_v39 = vadd.f32 %v3280_v20, %v843_v47  ;;  %vm3398_vm15 = vmor %vm860_vm2, %vm861_vm6 }
 0x12e   :  { %vm846_vm14 = vweird.f32 %v3280_v20  ;;  %v662_v16 = vsub.f32 1.0, %v661_v0  ;;  %1214 = vmatpush.msra.mxu1 %v3224_v5  ;;  %1284 = vmatpush.msra.mxu2 %v4181_v31  ;;  %v859_v34 = vadd.f32 %v3343_v27, %v858_v18  ;;  %v683_v4 = vsel %vm3381_vm11, %v2567_v62, %v679_v42  ;;  %v1084_v5 = vld [vmem:[%s4036_s4 + $0x20] sm:$0xff] }
 0x12f   :  { %v669_v6 = vand.u32 2147483647, %v4174_v7  ;;  %v646_v10 = vmul.f32 %v4183_v32, %v4182_v36  ;;  %vm845_vm0 = vweird.f32 %v3198_v33  ;;  %vm3403_vm12 = vcmp.eq.f32.partialorder %v849_v26, 8.507059e+37  ;;  %v1091_v33 = vld [vmem:[%s4036_s4 + $0x58] sm:$0xff] }
 0x130   :  { %v663_v14 = vmul.f32 %v4175_v53, %v662_v16  ;;  %vm665_vm7 = vweird.f32 %v4174_v7  ;;  %1215 = vmatpush.msra.mxu1 %v3285_v11  ;;  %1285 = vmatpush.msra.mxu2 %v3294_v49  ;;  %v863_v62 = vsel %vm3398_vm15, %v3343_v27, %v859_v34  ;;  %vm3416_vm13 = vmor %vm845_vm0, %vm846_vm14  ;;  %v852_v2 = vor.u32 1.1754944e-38, %v851_v58  ;;  %v1109_v27 = vld [vmem:[%s4036_s4 + $0xe8] sm:$0xff] }
 0x131   :  { %vm666_vm5 = vweird.f32 %v4175_v53  ;;  %v647_v9 = vsub.f32 1.0, %v646_v10  ;;  %v688_v56 = vsel %vm3374_vm3, %v687_v52, %v683_v4  ;;  %v848_v11 = vsel %vm3416_vm13, %v3280_v20, %v844_v39  ;;  %v1083_v52 = vld [vmem:[%s4036_s4 + $0x18] sm:$0xff]  ;;  %v1082_v10 = vld [vmem:[%s4036_s4 + $0x10] sm:$0xff] }
 0x132   :  { %v664_v49 = vadd.f32 %v4175_v53, %v663_v14  ;;  %v671_v17 = vand.u32 2147483648, %v4174_v7  ;;  %1216 = vmatpush.msra.mxu1 %v3334_v15  ;;  %1286 = vmatpush.msra.mxu2 %v883_v29  ;;  %vm3429_vm10 = vcmp.eq.f32.partialorder %v669_v6, 8.507059e+37  ;;  %vm651_vm2 = vweird.f32 %v4183_v32  ;;  %vm3441_vm8 = vmor %vm665_vm7, %vm666_vm5  ;;  %v1080_v6 = vld [vmem:[%s4036_s4] sm:$0xff]  ;;  %v1089_v14 = vld [vmem:[%s4036_s4 + $0x48] sm:$0xff] }
 0x133   :  { %v648_v48 = vmul.f32 %v4183_v32, %v647_v9  ;;  %v631_v12 = vmul.f32 %v4193_v55, %v4192_v45  ;;  %v868_v20 = vsel %vm3360_vm9, %v867_v46, %v863_v62  ;;  %vm650_vm1 = vweird.f32 %v4182_v36  ;;  %v1086_v62 = vld [vmem:[%s4036_s4 + $0x30] sm:$0xff]  ;;  %v1093_v9 = vld [vmem:[%s4036_s4 + $0x68] sm:$0xff] }
 0x134   :  { %v654_v22 = vand.u32 2147483647, %v4182_v36  ;;  %v656_v50 = vand.u32 2147483648, %v4182_v36  ;;  %1217 = vmatpush.msra.mxu1 %v703_v57  ;;  %1287 = vmatpush.msra.mxu2 %v868_v20  ;;  %v853_v51 = vsel %vm3403_vm12, %v852_v2, %v848_v11  ;;  %v668_v61 = vsel %vm3441_vm8, %v4175_v53, %v664_v49  ;;  %vm3459_vm9 = vmor %vm650_vm1, %vm651_vm2  ;;  %v4200_v57 = vld [vmem:[#allocation17_spill] sm:$0xff]  ;;  %v1088_v2 = vld [vmem:[%s4036_s4 + $0x40] sm:$0xff] }
 0x135   :  { %v649_v15 = vadd.f32 %v4183_v32, %v648_v48  ;;  %v632_v24 = vsub.f32 1.0, %v631_v12  ;;  %v672_v25 = vor.u32 1.1754944e-38, %v671_v17  ;;  %vm635_vm4 = vweird.f32 %v4192_v45  ;;  %v1095_v11 = vld [vmem:[%s4036_s4 + $0x78] sm:$0xff]  ;;  %v1092_v49 = vld [vmem:[%s4036_s4 + $0x60] sm:$0xff]  ;;  %v1097_v17 = vld [vmem:[%s4036_s4 + $0x88] sm:$0xff] }
 0x136   :  { %v641_v29 = vand.u32 2147483648, %v4192_v45  ;;  %v616_v63 = vmul.f32 %v4199_v40, %v4198_v41  ;;  %1218 = vmatpush.msra.mxu1 %v688_v56  ;;  %1288 = vmatpush.msra.mxu2 %v853_v51  ;;  %vm636_vm6 = vweird.f32 %v4193_v55  ;;  %v639_v13 = vand.u32 2147483647, %v4192_v45  ;;  %v1090_v56 = vld [vmem:[%s4036_s4 + $0x50] sm:$0xff]  ;;  %v1099_v48 = vld [vmem:[%s4036_s4 + $0x98] sm:$0xff]  ;;  %v1096_v45 = vld [vmem:[%s4036_s4 + $0x80] sm:$0xff]  ;;  %v3568_v51 = vpop.permute.xlu2 %1190 }
 0x137   :  { %v653_v37 = vsel %vm3459_vm9, %v4183_v32, %v649_v15  ;;  %v633_v3 = vmul.f32 %v4193_v55, %v632_v24  ;;  %v673_v30 = vsel %vm3429_vm10, %v672_v25, %v668_v61  ;;  %vm655_vm3 = vcmp.eq.f32.partialorder %v654_v22, 8.507059e+37  ;;  %1289 = vmatmul.f32.vlgmr.msra.gmra.mxu2 %v1081_v1  ;;  %vm637_vm14 = vmor %vm635_vm4, %vm636_vm6  ;;  %v1085_v32 = vld [vmem:[%s4036_s4 + $0x28] sm:$0xff]  ;;  %v1098_v12 = vld [vmem:[%s4036_s4 + $0x90] sm:$0xff]  ;;  %v3576_v24 = vpop.permute.xlu1 %1195 }
 0x138   :  { %v657_v60 = vor.u32 1.1754944e-38, %v656_v50  ;;  %v617_v21 = vsub.f32 1.0, %v616_v63  ;;  %1219 = vmatpush.msra.mxu1 %v673_v30  ;;  %vm621_vm11 = vweird.f32 %v4199_v40  ;;  %v626_v23 = vand.u32 2147483648, %v4198_v41  ;;  %v1103_v20 = vld [vmem:[%s4036_s4 + $0xb8] sm:$0xff]  ;;  %v1100_v22 = vld [vmem:[%s4036_s4 + $0xa0] sm:$0xff]  ;;  %v1105_v50 = vld [vmem:[%s4036_s4 + $0xc8] sm:$0xff] }
 0x139   :  { %v634_v28 = vadd.f32 %v4193_v55, %v633_v3  ;;  %v601_v43 = vmul.f32 %v4201_v38, %v4200_v57  ;;  %v642_v42 = vor.u32 1.1754944e-38, %v641_v29  ;;  %v624_v26 = vand.u32 2147483647, %v4198_v41  ;;  %v1102_v61 = vld [vmem:[%s4036_s4 + $0xb0] sm:$0xff]  ;;  %v1107_v15 = vld [vmem:[%s4036_s4 + $0xd8] sm:$0xff]  ;;  %v1104_v1 = vld [vmem:[%s4036_s4 + $0xc0] sm:$0xff]  ;;  %v3586_v29 = vpop.permute.xlu0 %1200 }
 0x13a   :  { %v658_v46 = vsel %vm655_vm3, %v657_v60, %v653_v37  ;;  %v618_v47 = vmul.f32 %v4199_v40, %v617_v21  ;;  %vm640_vm15 = vcmp.eq.f32.partialorder %v639_v13, 8.507059e+37  ;;  %vm620_vm0 = vweird.f32 %v4198_v41  ;;  %v1106_v41 = vld [vmem:[%s4036_s4 + $0xd0] sm:$0xff]  ;;  %v1111_v37 = vld [vmem:[%s4036_s4 + $0xf8] sm:$0xff]  ;;  %v1108_v3 = vld [vmem:[%s4036_s4 + $0xe0] sm:$0xff] }
 0x13b   :  { %1220 = vmatpush.msra.mxu1 %v658_v46  ;;  %v638_v7 = vsel %vm637_vm14, %v4193_v55, %v634_v28  ;;  %v602_v53 = vsub.f32 1.0, %v601_v43  ;;  %v611_v18 = vand.u32 2147483648, %v4200_v57  ;;  %vm622_vm12 = vmor %vm620_vm0, %vm621_vm11  ;;  %v627_v44 = vor.u32 1.1754944e-38, %v626_v23  ;;  %v1101_v55 = vld [vmem:[%s4036_s4 + $0xa8] sm:$0xff]  ;;  %v1110_v21 = vld [vmem:[%s4036_s4 + $0xf0] sm:$0xff] }
 0x13c   :  { %v643_v0 = vsel %vm640_vm15, %v642_v42, %v638_v7  ;;  %v619_v54 = vadd.f32 %v4199_v40, %v618_v47  ;;  %vm606_vm7 = vweird.f32 %v4201_v38  ;;  %v609_v35 = vand.u32 2147483647, %v4200_v57 }
 0x13d   :  { %1221 = vmatpush.msra.mxu1 %v643_v0  ;;  %v603_v58 = vmul.f32 %v4201_v38, %v602_v53  ;;  %vm625_vm13 = vcmp.eq.f32.partialorder %v624_v26, 8.507059e+37  ;;  %vm605_vm5 = vweird.f32 %v4200_v57  ;;  %v612_v34 = vor.u32 1.1754944e-38, %v611_v18 }
 0x13e   :  { %v623_v39 = vsel %vm622_vm12, %v4199_v40, %v619_v54  ;;  %vm607_vm10 = vmor %vm605_vm5, %vm606_vm7  ;;  %vm610_vm2 = vcmp.eq.f32.partialorder %v609_v35, 8.507059e+37  ;;  %v3581_v25 = vpop.permute.xlu2 %1175 }
 0x13f   :  { %v628_v16 = vsel %vm625_vm13, %v627_v44, %v623_v39  ;;  %v604_v31 = vadd.f32 %v4201_v38, %v603_v58  ;;  %1292 = vmatmul.f32.gmra.mxu2 %v1083_v52  ;;  %v3591_v40 = vpop.permute.xlu1 %1180 }
 0x140   :  { %1222 = vmatpush.msra.mxu1 %v628_v16 }
 0x141   :  { %v608_v4 = vsel %vm607_vm10, %v4201_v38, %v604_v31  ;;  %v1186_v13 = vpop.permute.xlu0 %1185 }
 0x142   :  { %v613_v36 = vsel %vm610_vm2, %v612_v34, %v608_v4 }
 0x143   :  { %1223 = vmatpush.msra.mxu1 %v613_v36 }
 0x144   :  { %1224 = vmatmul.f32.vlgmr.msra.gmra.mxu1 %v1080_v6 }
 0x146   :  { %v1161_v63 = vpop.permute.xlu2 %1160 }
 0x147   :  { %1295 = vmatmul.f32.gmra.mxu2 %v1085_v32  ;;  %v1166_v30 = vpop.permute.xlu1 %1165 }
 0x149   :  { %v1171_v23 = vpop.permute.xlu0 %1170 }
 0x14c   :  { %1227 = vmatmul.f32.gmra.mxu1 %v1082_v10 }
 0x14e   :  { %v1146_v60 = vpop.permute.xlu2 %1145 }
 0x14f   :  { %1298 = vmatmul.f32.gmra.mxu2 %v1087_v59  ;;  %v1151_v57 = vpop.permute.xlu1 %1150 }
 0x151   :  { %v1156_v26 = vpop.permute.xlu0 %1155 }
 0x154   :  { %1230 = vmatmul.f32.gmra.mxu1 %v1084_v5 }
 0x156   :  { %v1131_v38 = vpop.permute.xlu2 %1130 }
 0x157   :  { %1301 = vmatmul.f32.gmra.mxu2 %v1089_v14  ;;  %v1136_v7 = vpop.permute.xlu1 %1135 }
 0x159   :  { %v1141_v44 = vpop.permute.xlu0 %1140 }
 0x15c   :  { %1233 = vmatmul.f32.gmra.mxu1 %v1086_v62 }
 0x15f   :  { %1304 = vmatmul.f32.gmra.mxu2 %v1091_v33 }
 0x164   :  { %1236 = vmatmul.f32.gmra.mxu1 %v1088_v2 }
 0x167   :  { %1307 = vmatmul.f32.gmra.mxu2 %v1093_v9 }
 0x16c   :  { %1239 = vmatmul.f32.gmra.mxu1 %v1090_v56 }
 0x16f   :  { %1310 = vmatmul.f32.gmra.mxu2 %v1095_v11 }
 0x174   :  { %1242 = vmatmul.f32.gmra.mxu1 %v1092_v49 }
 0x177   :  { %1313 = vmatmul.f32.gmra.mxu2 %v1097_v17 }
 0x17c   :  { %1245 = vmatmul.f32.gmra.mxu1 %v1094_v8 }
 0x17f   :  { %1316 = vmatmul.f32.gmra.mxu2 %v1099_v48 }
 0x184   :  { %1248 = vmatmul.f32.gmra.mxu1 %v1096_v45 }
 0x187   :  { %1319 = vmatmul.f32.gmra.mxu2 %v1101_v55 }
 0x18c   :  { %1251 = vmatmul.f32.gmra.mxu1 %v1098_v12 }
 0x18f   :  { %1322 = vmatmul.f32.gmra.mxu2 %v1103_v20 }
 0x194   :  { %1254 = vmatmul.f32.gmra.mxu1 %v1100_v22 }
 0x197   :  { %1325 = vmatmul.f32.gmra.mxu2 %v1105_v50 }
 0x19c   :  { %1257 = vmatmul.f32.gmra.mxu1 %v1102_v61 }
 0x19f   :  { %1328 = vmatmul.f32.gmra.mxu2 %v1107_v15 }
 0x1a4   :  { %1260 = vmatmul.f32.gmra.mxu1 %v1104_v1 }
 0x1a7   :  { %1331 = vmatmul.f32.gmra.mxu2 %v1109_v27 }
 0x1ac   :  { %1263 = vmatmul.f32.gmra.mxu1 %v1106_v41 }
 0x1af   :  { %1334 = vmatmul.f32.gmra.mxu2 %v1111_v37 }
 0x1b4   :  { %1266 = vmatmul.f32.gmra.mxu1 %v1108_v3 }
 0x1ba   :  { %v1290_v28 = vpop.f32.mrf.mxu2 }
 0x1bc   :  { %1269 = vmatmul.f32.gmra.mxu1 %v1110_v21 }
 0x1c1   :  { %v1225_v43 = vpop.f32.mrf.mxu1 }
 0x1c2   :  { %v1226_v46 = vadd.f32 %v1225_v43, %v1131_v38  ;;  %v1293_v42 = vpop.f32.mrf.mxu2 }
 0x1c4   :  { %v1291_v47 = vadd.f32 %v1290_v28, %v1226_v46 }
 0x1c6   :  { %v1835_v1 = vmul.f32 -1.442695, %v1291_v47 }
 0x1c8   :  { %1990 = vpow2.f32 %v1835_v1 }
 0x1c9   :  { %v1228_v53 = vpop.f32.mrf.mxu1 }
 0x1ca   :  { %v1229_v0 = vadd.f32 %v1228_v53, %v1136_v7  ;;  %v1296_v54 = vpop.f32.mrf.mxu2 }
 0x1cc   :  { %v1294_v18 = vadd.f32 %v1293_v42, %v1229_v0 }
 0x1ce   :  { %v1991_v3 = vpop.eup %1990 }
 0x1cf   :  { %v3604_v38 = vadd.f32 1.0, %v1991_v3 }
 0x1d1   :  { %v1231_v58 = vpop.f32.mrf.mxu1 }
 0x1d2   :  { %v1232_v35 = vadd.f32 %v1231_v58, %v1141_v44  ;;  %v1299_v52 = vpop.f32.mrf.mxu2 }
 0x1d4   :  { %v1297_v39 = vadd.f32 %v1296_v54, %v1232_v35 }
 0x1d6   :  { %v1837_v43 = vmul.f32 -1.442695, %v1297_v39 }
 0x1d9   :  { %v1234_v16 = vpop.f32.mrf.mxu1 }
 0x1da   :  { %v1235_v31 = vadd.f32 %v1234_v16, %v1146_v60  ;;  %v1302_v34 = vpop.f32.mrf.mxu2  ;;  %v1836_v60 = vmul.f32 -1.442695, %v1294_v18 }
 0x1dc   :  { %v1300_v4 = vadd.f32 %v1299_v52, %v1235_v31 }
 0x1de   :  { %v1838_v47 = vmul.f32 -1.442695, %v1300_v4 }
 0x1e1   :  { %v1237_v6 = vpop.f32.mrf.mxu1 }
 0x1e2   :  { %v1238_v36 = vadd.f32 %v1237_v6, %v1151_v57  ;;  %v1305_v32 = vpop.f32.mrf.mxu2 }
 0x1e4   :  { %v1303_v10 = vadd.f32 %v1302_v34, %v1238_v36 }
 0x1e6   :  { %v1839_v7 = vmul.f32 -1.442695, %v1303_v10 }
 0x1e9   :  { %v1240_v59 = vpop.f32.mrf.mxu1 }
 0x1ea   :  { %v1241_v5 = vadd.f32 %v1240_v59, %v1156_v26  ;;  %v1308_v14 = vpop.f32.mrf.mxu2 }
 0x1ec   :  { %v1306_v62 = vadd.f32 %v1305_v32, %v1241_v5 }
 0x1f1   :  { %v1243_v33 = vpop.f32.mrf.mxu1 }
 0x1f2   :  { %v1244_v2 = vadd.f32 %v1243_v33, %v1161_v63  ;;  %v1311_v9 = vpop.f32.mrf.mxu2 }
 0x1f4   :  { %v1309_v56 = vadd.f32 %v1308_v14, %v1244_v2 }
 0x1f6   :  { %v1841_v35 = vmul.f32 -1.442695, %v1309_v56 }
 0x1f9   :  { %v1246_v11 = vpop.f32.mrf.mxu1 }
 0x1fa   :  { %v1247_v49 = vadd.f32 %v1246_v11, %v1166_v30  ;;  %v1314_v17 = vpop.f32.mrf.mxu2 }
 0x1fc   :  { %v1312_v8 = vadd.f32 %v1311_v9, %v1247_v49 }
 0x201   :  { %v1249_v48 = vpop.f32.mrf.mxu1 }
 0x202   :  { %v1250_v45 = vadd.f32 %v1249_v48, %v1171_v23  ;;  %v1317_v55 = vpop.f32.mrf.mxu2 }
 0x204   :  { %v1315_v12 = vadd.f32 %v1314_v17, %v1250_v45 }
 0x206   :  { %v1843_v36 = vmul.f32 -1.442695, %v1315_v12 }
 0x209   :  { %v1252_v20 = vpop.f32.mrf.mxu1 }
 0x20a   :  { %v1320_v22 = vpop.f32.mrf.mxu2 }
 0x211   :  { %v1255_v50 = vpop.f32.mrf.mxu1 }
 0x212   :  { %v1323_v61 = vpop.f32.mrf.mxu2  ;;  %v1256_v23 = vadd.f32 %v1255_v50, %v3591_v40  ;;  %v1840_v40 = vmul.f32 -1.442695, %v1306_v62 }
 0x214   :  { %v1321_v26 = vadd.f32 %v1320_v22, %v1256_v23 }
 0x216   :  { %v1845_v18 = vmul.f32 -1.442695, %v1321_v26 }
 0x219   :  { %v1258_v15 = vpop.f32.mrf.mxu1 }
 0x21a   :  { %v1326_v27 = vpop.f32.mrf.mxu2  ;;  %v1259_v41 = vadd.f32 %v1258_v15, %v1186_v13  ;;  %v1253_v13 = vadd.f32 %v1252_v20, %v3581_v25  ;;  %v1842_v25 = vmul.f32 -1.442695, %v1312_v8 }
 0x21c   :  { %v1324_v21 = vadd.f32 %v1323_v61, %v1259_v41  ;;  %v1318_v54 = vadd.f32 %v1317_v55, %v1253_v13 }
 0x21e   :  { %v1846_v46 = vmul.f32 -1.442695, %v1324_v21  ;;  %v1844_v34 = vmul.f32 -1.442695, %v1318_v54 }
 0x221   :  { %v1261_v63 = vpop.f32.mrf.mxu1 }
 0x222   :  { %v1262_v37 = vadd.f32 %v1261_v63, %v3568_v51  ;;  %v1329_v28 = vpop.f32.mrf.mxu2 }
 0x224   :  { %v1327_v30 = vadd.f32 %v1326_v27, %v1262_v37 }
 0x226   :  { %v1847_v57 = vmul.f32 -1.442695, %v1327_v30 }
 0x228   :  { %1992 = vpow2.f32 %v1847_v57 }
 0x229   :  { %1994 = vpow2.f32 %v1836_v60  ;;  %v1264_v42 = vpop.f32.mrf.mxu1 }
 0x22a   :  { %v1265_v51 = vadd.f32 %v1264_v42, %v3576_v24  ;;  %1996 = vrcp.f32 %v3604_v38  ;;  %v1332_v52 = vpop.f32.mrf.mxu2 }
 0x22b   :  { %1998 = vpow2.f32 %v1837_v43 }
 0x22c   :  { %v1330_v53 = vadd.f32 %v1329_v28, %v1265_v51  ;;  %2000 = vpow2.f32 %v1846_v46 }
 0x22d   :  { %2002 = vpow2.f32 %v1838_v47 }
 0x22e   :  { %v1993_v0 = vpop.eup %1992  ;;  %v1848_v44 = vmul.f32 -1.442695, %v1330_v53  ;;  %2004 = vpow2.f32 %v1839_v7 }
 0x22f   :  { %v1995_v58 = vpop.eup %1994  ;;  %v3611_v24 = vadd.f32 1.0, %v1993_v0 }
 0x230   :  { %2006 = vpow2.f32 %v1848_v44  ;;  %v3609_v39 = vpop.eup %1996  ;;  %v3617_v2 = vadd.f32 1.0, %v1995_v58 }
 0x231   :  { %2008 = vpow2.f32 %v1840_v40  ;;  %v1267_v16 = vpop.f32.mrf.mxu1  ;;  %v1999_v31 = vpop.eup %1998  ;;  %vm1587_vm1 = vweird.f32 %v3611_v24 }
 0x232   :  { %2010 = vpow2.f32 %v1845_v18  ;;  %v1268_v4 = vadd.f32 %v1267_v16, %v3586_v29  ;;  %v2001_v6 = vpop.eup %2000  ;;  %v3621_v56 = vadd.f32 1.0, %v1999_v31  ;;  %v1335_v8 = vpop.f32.mrf.mxu2 }
 0x233   :  { %2012 = vpow2.f32 %v1841_v35  ;;  %v2003_v32 = vpop.eup %2002  ;;  %v3615_v14 = vadd.f32 1.0, %v2001_v6 }
 0x234   :  { %2014 = vpow2.f32 %v1842_v25  ;;  %v1333_v10 = vadd.f32 %v1332_v52, %v1268_v4  ;;  %v2005_v59 = vpop.eup %2004  ;;  %v3623_v49 = vadd.f32 1.0, %v2003_v32  ;;  %v1591_v52 = vand.u32 2147483647, %v3611_v24 }
 0x235   :  { %2016 = vrcp.f32 %v3611_v24  ;;  %v3626_v45 = vadd.f32 1.0, %v2005_v59  ;;  %v1593_v25 = vand.u32 2147483648, %v3611_v24  ;;  %vm1572_vm15 = vweird.f32 %v3615_v14 }
 0x236   :  { %v2007_v5 = vpop.eup %2006  ;;  %2018 = vpow2.f32 %v1844_v34  ;;  %v1849_v62 = vmul.f32 -1.442695, %v1333_v10  ;;  %vm1592_vm11 = vcmp.eq.f32.partialorder %v1591_v52, 8.507059e+37 }
 0x237   :  { %v2009_v33 = vpop.eup %2008  ;;  %2020 = vpow2.f32 %v1843_v36  ;;  %v3619_v9 = vadd.f32 1.0, %v2007_v5 }
 0x238   :  { %v2011_v29 = vpop.eup %2010  ;;  %2022 = vpow2.f32 %v1849_v62  ;;  %v3638_v1 = vadd.f32 1.0, %v2009_v33  ;;  %v1576_v33 = vand.u32 2147483647, %v3615_v14 }
 0x239   :  { %v2013_v11 = vpop.eup %2012  ;;  %2024 = vrcp.f32 %v3619_v9  ;;  %v1270_v17 = vpop.f32.mrf.mxu1  ;;  %v3633_v20 = vadd.f32 1.0, %v2011_v29  ;;  %v1606_v53 = vand.u32 2147483647, %v3619_v9  ;;  %v1608_v40 = vand.u32 2147483648, %v3619_v9 }
 0x23a   :  { %v2015_v48 = vpop.eup %2014  ;;  %2026 = vrcp.f32 %v3615_v14  ;;  %v1271_v55 = vadd.f32 %v1270_v17, %v3560_v19  ;;  %v3651_v30 = vadd.f32 1.0, %v2013_v11  ;;  %vm1602_vm9 = vweird.f32 %v3619_v9 }
 0x23b   :  { %v3630_v12 = vpop.eup %2016  ;;  %2028 = vrcp.f32 %v3617_v2  ;;  %v3655_v28 = vadd.f32 1.0, %v2015_v48  ;;  %v1609_v32 = vor.u32 1.1754944e-38, %v1608_v40  ;;  %vm3720_vm3 = vcmp.eq.f32.partialorder %v1606_v53, 8.507059e+37 }
 0x23c   :  { %v2019_v22 = vpop.eup %2018  ;;  %2030 = vrcp.f32 %v3621_v56  ;;  %v1336_v50 = vadd.f32 %v1335_v8, %v1271_v55  ;;  %v1583_v19 = vmul.f32 %v3630_v12, %v3611_v24  ;;  %vm1588_vm8 = vweird.f32 %v3630_v12 }
 0x23d   :  { %v2021_v61 = vpop.eup %2020  ;;  %2032 = vrcp.f32 %v3623_v49  ;;  %v3644_v63 = vadd.f32 1.0, %v2019_v22  ;;  %vm3707_vm6 = vmor %vm1587_vm1, %vm1588_vm8  ;;  %v1594_v17 = vor.u32 1.1754944e-38, %v1593_v25  ;;  %v1578_v22 = vand.u32 2147483648, %v3615_v14 }
 0x23e   :  { %v2023_v15 = vpop.eup %2022  ;;  %2034 = vrcp.f32 %v3626_v45  ;;  %v1850_v27 = vmul.f32 -1.442695, %v1336_v50  ;;  %v1584_v60 = vsub.f32 1.0, %v1583_v19  ;;  %v3663_v43 = vadd.f32 1.0, %v2021_v61 }
 0x23f   :  { %v3642_v41 = vpop.eup %2024  ;;  %2036 = vrcp.f32 %v3633_v20  ;;  %v3647_v37 = vadd.f32 1.0, %v2023_v15  ;;  %vm1557_vm12 = vweird.f32 %v3633_v20  ;;  %vm3737_vm13 = vcmp.eq.f32.partialorder %v1576_v33, 8.507059e+37 }
 0x240   :  { %v3649_v3 = vpop.eup %2026  ;;  %2038 = vpow2.f32 %v1850_v27  ;;  %v1598_v23 = vmul.f32 %v3642_v41, %v3619_v9  ;;  %v1585_v42 = vmul.f32 %v3630_v12, %v1584_v60  ;;  %vm1603_vm4 = vweird.f32 %v3642_v41 }
 0x241   :  { %v3653_v21 = vpop.eup %2028  ;;  %2040 = vrcp.f32 %v3647_v37  ;;  %v1568_v47 = vmul.f32 %v3649_v3, %v3615_v14  ;;  %v1623_v34 = vand.u32 2147483648, %v3647_v37  ;;  %v1621_v36 = vand.u32 2147483647, %v3647_v37  ;;  %vm3749_vm10 = vmor %vm1602_vm9, %vm1603_vm4 }
 0x242   :  { %v3660_v57 = vpop.eup %2030  ;;  %2042 = vrcp.f32 %v3638_v1  ;;  %v1599_v51 = vsub.f32 1.0, %v1598_v23  ;;  %v1586_v18 = vadd.f32 %v3630_v12, %v1585_v42  ;;  %vm1617_vm14 = vweird.f32 %v3647_v37 }
 0x243   :  { %v3665_v46 = vpop.eup %2032  ;;  %2044 = vrcp.f32 %v3644_v63  ;;  %v1569_v44 = vsub.f32 1.0, %v1568_v47  ;;  %v1624_v55 = vor.u32 1.1754944e-38, %v1623_v34  ;;  %vm1573_vm0 = vweird.f32 %v3649_v3 }
 0x244   :  { %v3671_v13 = vpop.eup %2034  ;;  %2046 = vrcp.f32 %v3651_v30  ;;  %v1600_v4 = vmul.f32 %v3642_v41, %v1599_v51  ;;  %v1590_v24 = vsel %vm3707_vm6, %v3630_v12, %v1586_v18  ;;  %vm3756_vm2 = vcmp.eq.f32.partialorder %v1621_v36, 8.507059e+37  ;;  %vm3768_vm1 = vmor %vm1572_vm15, %vm1573_vm0 }
 0x245   :  { %v3674_v26 = vpop.eup %2036  ;;  %2048 = vrcp.f32 %v3655_v28  ;;  %v1570_v62 = vmul.f32 %v3649_v3, %v1569_v44  ;;  %v3730_v50 = vsel %vm1592_vm11, %v1594_v17, %v1590_v24  ;;  %v1579_v9 = vor.u32 1.1754944e-38, %v1578_v22 }
 0x246   :  { %v2039_v7 = vpop.eup %2038  ;;  %2050 = vrcp.f32 %v3663_v43  ;;  %v1553_v16 = vmul.f32 %v3674_v26, %v3633_v20  ;;  %v1601_v12 = vadd.f32 %v3642_v41, %v1600_v4  ;;  %vm1558_vm7 = vweird.f32 %v3674_v26 }
 0x247   :  { %v3680_v0 = vpop.eup %2040  ;;  %v3682_v54 = vadd.f32 1.0, %v2039_v7  ;;  %v1571_v27 = vadd.f32 %v3649_v3, %v1570_v62  ;;  %v1561_v52 = vand.u32 2147483647, %v3633_v20  ;;  %v1563_v25 = vand.u32 2147483648, %v3633_v20  ;;  %vm3792_vm6 = vmor %vm1557_vm12, %vm1558_vm7 }
 0x248   :  { %v3686_v58 = vpop.eup %2042  ;;  %v1613_v35 = vmul.f32 %v3680_v0, %v3647_v37  ;;  %v1554_v8 = vsub.f32 1.0, %v1553_v16  ;;  %vm1618_vm5 = vweird.f32 %v3680_v0  ;;  %v1605_v18 = vsel %vm3749_vm10, %v3642_v41, %v1601_v12 }
 0x249   :  { %v3694_v31 = vpop.eup %2044  ;;  %2052 = vrcp.f32 %v3682_v54  ;;  %v1636_v7 = vand.u32 2147483647, %v3682_v54  ;;  %v1638_v53 = vand.u32 2147483648, %v3682_v54  ;;  %vm1632_vm8 = vweird.f32 %v3682_v54  ;;  %vm3800_vm11 = vmor %vm1617_vm14, %vm1618_vm5 }
 0x24a   :  { %v3700_v6 = vpop.eup %2046  ;;  %v1614_v5 = vsub.f32 1.0, %v1613_v35  ;;  %v1538_v48 = vmul.f32 %v3694_v31, %v3644_v63  ;;  %v1555_v47 = vmul.f32 %v3674_v26, %v1554_v8  ;;  %v1575_v41 = vsel %vm3768_vm1, %v3649_v3, %v1571_v27 }
 0x24b   :  { %v3711_v59 = vpop.eup %2048  ;;  %vm3782_vm4 = vcmp.eq.f32.partialorder %v1636_v7, 8.507059e+37  ;;  %v1639_v24 = vor.u32 1.1754944e-38, %v1638_v53  ;;  %v1610_v62 = vsel %vm3720_vm3, %v1609_v32, %v1605_v18  ;;  %v1580_v32 = vsel %vm3737_vm13, %v1579_v9, %v1575_v41 }
 0x24c   :  { %v3718_v29 = vpop.eup %2050  ;;  %v1615_v15 = vmul.f32 %v3680_v0, %v1614_v5  ;;  %v1539_v51 = vsub.f32 1.0, %v1538_v48  ;;  %v1508_v4 = vmul.f32 %v3711_v59, %v3655_v28  ;;  %v1556_v14 = vadd.f32 %v3674_v26, %v1555_v47 }
 0x24d   :  { %v1523_v60 = vmul.f32 %v3718_v29, %v3663_v43  ;;  %vm3806_vm3 = vcmp.eq.f32.partialorder %v1561_v52, 8.507059e+37  ;;  %v1564_v20 = vor.u32 1.1754944e-38, %v1563_v25  ;;  %vm1543_vm14 = vweird.f32 %v3694_v31 }
 0x24e   :  { %v1616_v16 = vadd.f32 %v3680_v0, %v1615_v15  ;;  %v1540_v10 = vmul.f32 %v3694_v31, %v1539_v51  ;;  %v1509_v33 = vsub.f32 1.0, %v1508_v4  ;;  %v1546_v37 = vand.u32 2147483647, %v3644_v63 }
 0x24f   :  { %v2053_v61 = vpop.eup %2052  ;;  %v1524_v34 = vsub.f32 1.0, %v1523_v60  ;;  %v1560_v15 = vsel %vm3792_vm6, %v3674_v26, %v1556_v14  ;;  %vm1542_vm0 = vweird.f32 %v3644_v63  ;;  %vm1527_vm12 = vweird.f32 %v3663_v43 }
 0x250   :  { %v1628_v23 = vmul.f32 %v2053_v61, %v3682_v54  ;;  %vm1633_vm9 = vweird.f32 %v2053_v61  ;;  %v1620_v48 = vsel %vm3800_vm11, %v3680_v0, %v1616_v16  ;;  %v1541_v27 = vadd.f32 %v3694_v31, %v1540_v10  ;;  %vm3839_vm7 = vmor %vm1542_vm0, %vm1543_vm14 }
 0x251   :  { %vm1634_vm15 = vmor %vm1632_vm8, %vm1633_vm9  ;;  %v1525_v12 = vmul.f32 %v3718_v29, %v1524_v34  ;;  %v1493_v54 = vmul.f32 %v3700_v6, %v3651_v30  ;;  %v1548_v0 = vand.u32 2147483648, %v3644_v63  ;;  %v1510_v60 = vmul.f32 %v3711_v59, %v1509_v33 }
 0x252   :  { %v1629_v44 = vsub.f32 1.0, %v1628_v23  ;;  %v1531_v26 = vand.u32 2147483647, %v3663_v43  ;;  %v1478_v23 = vmul.f32 %v3686_v58, %v3638_v1  ;;  %v1565_v42 = vsel %vm3806_vm3, %v1564_v20, %v1560_v15 }
 0x253   :  { %v1526_v47 = vadd.f32 %v3718_v29, %v1525_v12  ;;  %vm1528_vm13 = vweird.f32 %v3718_v29  ;;  %v1545_v51 = vsel %vm3839_vm7, %v3694_v31, %v1541_v27  ;;  %vm1547_vm5 = vcmp.eq.f32.partialorder %v1546_v37, 8.507059e+37 }
 0x254   :  { %v1630_v36 = vmul.f32 %v2053_v61, %v1629_v44  ;;  %v1516_v7 = vand.u32 2147483647, %v3655_v28  ;;  %v1494_v53 = vsub.f32 1.0, %v1493_v54  ;;  %v1549_v40 = vor.u32 1.1754944e-38, %v1548_v0 }
 0x255   :  { %v1511_v18 = vadd.f32 %v3711_v59, %v1510_v60  ;;  %vm1513_vm10 = vweird.f32 %v3711_v59  ;;  %v1463_v9 = vmul.f32 %v3671_v13, %v3626_v45  ;;  %vm3860_vm8 = vcmp.eq.f32.partialorder %v1531_v26, 8.507059e+37 }
 0x256   :  { %v1631_v17 = vadd.f32 %v2053_v61, %v1630_v36  ;;  %vm1512_vm1 = vweird.f32 %v3655_v28  ;;  %v1518_v35 = vand.u32 2147483648, %v3655_v28  ;;  %v1479_v52 = vsub.f32 1.0, %v1478_v23 }
 0x257   :  { %v1550_v25 = vsel %vm1547_vm5, %v1549_v40, %v1545_v51  ;;  %vm1497_vm9 = vweird.f32 %v3651_v30  ;;  %vm3875_vm6 = vcmp.eq.f32.partialorder %v1516_v7, 8.507059e+37  ;;  %v1495_v28 = vmul.f32 %v3700_v6, %v1494_v53 }
 0x258   :  { %v1635_v22 = vsel %vm1634_vm15, %v2053_v61, %v1631_v17  ;;  %v1625_v61 = vsel %vm3756_vm2, %v1624_v55, %v1620_v48  ;;  %v1533_v55 = vand.u32 2147483648, %v3663_v43  ;;  %vm3856_vm2 = vmor %vm1527_vm12, %vm1528_vm13  ;;  %v1464_v4 = vsub.f32 1.0, %v1463_v9 }
 0x259   :  { %v1640_v19 = vsel %vm3782_vm4, %v1639_v24, %v1635_v22  ;;  %v1530_v16 = vsel %vm3856_vm2, %v3718_v29, %v1526_v47  ;;  %vm3871_vm4 = vmor %vm1512_vm1, %vm1513_vm10  ;;  %v1448_v36 = vmul.f32 %v3665_v46, %v3623_v49  ;;  %vm1498_vm11 = vweird.f32 %v3700_v6 }
 0x25a   :  { %1649 = vmatpush.msrb.mxu3 %v1640_v19  ;;  %v1534_v41 = vor.u32 1.1754944e-38, %v1533_v55  ;;  %v1515_v29 = vsel %vm3871_vm4, %v3711_v59, %v1511_v18  ;;  %v1503_v14 = vand.u32 2147483648, %v3651_v30  ;;  %v1519_v10 = vor.u32 1.1754944e-38, %v1518_v35  ;;  %vm3918_vm12 = vmor %vm1497_vm9, %vm1498_vm11 }
 0x25b   :  { %v1480_v5 = vmul.f32 %v3686_v58, %v1479_v52  ;;  %v1486_v24 = vand.u32 2147483647, %v3638_v1  ;;  %vm1482_vm3 = vweird.f32 %v3638_v1  ;;  %v1488_v59 = vand.u32 2147483648, %v3638_v1 }
 0x25c   :  { %1650 = vmatpush.msrb.mxu3 %v1625_v61  ;;  %v1535_v3 = vsel %vm3860_vm8, %v1534_v41, %v1530_v16  ;;  %v1433_v33 = vmul.f32 %v3660_v57, %v3621_v56  ;;  %v1520_v17 = vsel %vm3875_vm6, %v1519_v10, %v1515_v29  ;;  %v1496_v8 = vadd.f32 %v3700_v6, %v1495_v28 }
 0x25d   :  { %vm1483_vm15 = vweird.f32 %v3686_v58  ;;  %v1504_v20 = vor.u32 1.1754944e-38, %v1503_v14  ;;  %v1471_v48 = vand.u32 2147483647, %v3626_v45  ;;  %v1481_v12 = vadd.f32 %v3686_v58, %v1480_v5 }
 0x25e   :  { %1651 = vmatpush.msrb.mxu3 %v1610_v62  ;;  %v1449_v62 = vsub.f32 1.0, %v1448_v36  ;;  %v1434_v37 = vsub.f32 1.0, %v1433_v33  ;;  %vm3907_vm0 = vcmp.eq.f32.partialorder %v1486_v24, 8.507059e+37  ;;  %v1418_v27 = vmul.f32 %v3653_v21, %v3617_v2  ;;  %vm3934_vm5 = vmor %vm1482_vm3, %vm1483_vm15 }
 0x25f   :  { %v1489_v19 = vor.u32 1.1754944e-38, %v1488_v59  ;;  %vm1467_vm7 = vweird.f32 %v3626_v45  ;;  %vm1468_vm13 = vweird.f32 %v3671_v13  ;;  %v1473_v0 = vand.u32 2147483648, %v3626_v45 }
 0x260   :  { %1652 = vmatpush.msrb.mxu3 %v3730_v50  ;;  %v1501_v50 = vand.u32 2147483647, %v3651_v30  ;;  %v1450_v15 = vmul.f32 %v3665_v46, %v1449_v62  ;;  %v1500_v60 = vsel %vm3918_vm12, %v3700_v6, %v1496_v8  ;;  %v1435_v30 = vmul.f32 %v3660_v57, %v1434_v37  ;;  %vm3958_vm1 = vmor %vm1467_vm7, %vm1468_vm13  ;;  %v1642_v62 = vld [vmem:[%s4038_s6] sm:$0xf] }
 0x261   :  { %v1419_v26 = vsub.f32 1.0, %v1418_v27  ;;  %vm3938_vm10 = vcmp.eq.f32.partialorder %v1471_v48, 8.507059e+37  ;;  %vm1452_vm2 = vweird.f32 %v3623_v49  ;;  %v1456_v6 = vand.u32 2147483647, %v3623_v49 }
 0x262   :  { %1653 = vmatpush.msrb.mxu3 %v1580_v32  ;;  %v1465_v32 = vmul.f32 %v3671_v13, %v1464_v4  ;;  %vm3901_vm14 = vcmp.eq.f32.partialorder %v1501_v50, 8.507059e+37  ;;  %v1403_v63 = vmul.f32 %v3609_v39, %v3604_v38  ;;  %v1485_v1 = vsel %vm3934_vm5, %v3686_v58, %v1481_v12 }
 0x263   :  { %v1451_v47 = vadd.f32 %v3665_v46, %v1450_v15  ;;  %vm1453_vm8 = vweird.f32 %v3665_v46  ;;  %v1420_v55 = vmul.f32 %v3653_v21, %v1419_v26  ;;  %v1505_v51 = vsel %vm3901_vm14, %v1504_v20, %v1500_v60  ;;  %v1861_v15 = vld [vmem:[%s4033_s1] ss:$0 sm:$0xff] }
 0x264   :  { %1654 = vmatpush.msrb.mxu3 %v1565_v42  ;;  %v1466_v61 = vadd.f32 %v3671_v13, %v1465_v32  ;;  %v1474_v53 = vor.u32 1.1754944e-38, %v1473_v0  ;;  %v1458_v58 = vand.u32 2147483648, %v3623_v49  ;;  %v1404_v40 = vsub.f32 1.0, %v1403_v63  ;;  %vm3973_vm6 = vmor %vm1452_vm2, %vm1453_vm8 }
 0x265   :  { %v1436_v9 = vadd.f32 %v3660_v57, %v1435_v30  ;;  %vm1437_vm9 = vweird.f32 %v3621_v56  ;;  %vm1438_vm4 = vweird.f32 %v3660_v57  ;;  %v1490_v45 = vsel %vm3907_vm0, %v1489_v19, %v1485_v1 }
 0x266   :  { %1655 = vmatpush.msrb.mxu3 %v1550_v25  ;;  %v1470_v18 = vsel %vm3958_vm1, %v3671_v13, %v1466_v61  ;;  %vm3977_vm11 = vcmp.eq.f32.partialorder %v1456_v6, 8.507059e+37  ;;  %v1443_v13 = vand.u32 2147483648, %v3621_v56  ;;  %v1405_v35 = vmul.f32 %v3609_v39, %v1404_v40  ;;  %vm3991_vm15 = vmor %vm1437_vm9, %vm1438_vm4 }
 0x267   :  { %v1455_v52 = vsel %vm3973_vm6, %v3665_v46, %v1451_v47  ;;  %v1441_v25 = vand.u32 2147483647, %v3621_v56  ;;  %v1421_v49 = vadd.f32 %v3653_v21, %v1420_v55  ;;  %vm1423_vm3 = vweird.f32 %v3653_v21 }
 0x268   :  { %1656 = vmatpush.msrb.mxu3 %v1535_v3  ;;  %v1475_v16 = vsel %vm3938_vm10, %v1474_v53, %v1470_v18  ;;  %v1459_v41 = vor.u32 1.1754944e-38, %v1458_v58  ;;  %vm1422_vm14 = vweird.f32 %v3617_v2  ;;  %v1428_v34 = vand.u32 2147483648, %v3617_v2  ;;  %v1647_v3 = vpop.permute.xlu0 %1646 }
 0x269   :  { %v1440_v56 = vsel %vm3991_vm15, %v3660_v57, %v1436_v9  ;;  %v1426_v46 = vand.u32 2147483647, %v3617_v2  ;;  %v1406_v28 = vadd.f32 %v3609_v39, %v1405_v35  ;;  %vm1408_vm0 = vweird.f32 %v3609_v39  ;;  %vm1424_vm12 = vmor %vm1422_vm14, %vm1423_vm3 }
 0x26a   :  { %1657 = vmatpush.msrb.mxu3 %v1520_v17  ;;  %v1460_v4 = vsel %vm3977_vm11, %v1459_v41, %v1455_v52  ;;  %v1444_v36 = vor.u32 1.1754944e-38, %v1443_v13  ;;  %v1413_v29 = vand.u32 2147483648, %v3604_v38  ;;  %vm1442_vm7 = vcmp.eq.f32.partialorder %v1441_v25, 8.507059e+37 }
 0x26b   :  { %v1425_v50 = vsel %vm1424_vm12, %v3653_v21, %v1421_v49  ;;  %vm1407_vm13 = vweird.f32 %v3604_v38  ;;  %v1411_v57 = vand.u32 2147483647, %v3604_v38  ;;  %v1429_v14 = vor.u32 1.1754944e-38, %v1428_v34 }
 0x26c   :  { %1658 = vmatpush.msrb.mxu3 %v1505_v51  ;;  %v1445_v2 = vsel %vm1442_vm7, %v1444_v36, %v1440_v56  ;;  %vm1409_vm5 = vmor %vm1407_vm13, %vm1408_vm0  ;;  %vm1427_vm10 = vcmp.eq.f32.partialorder %v1426_v46, 8.507059e+37  ;;  %v1414_v24 = vor.u32 1.1754944e-38, %v1413_v29  ;;  %vm1669_vm8 = vcmask 60416  }
 0x26d   :  { %v1410_v10 = vsel %vm1409_vm5, %v3609_v39, %v1406_v28  ;;  %v1430_v5 = vsel %vm1427_vm10, %v1429_v14, %v1425_v50  ;;  %vm1412_vm2 = vcmp.eq.f32.partialorder %v1411_v57, 8.507059e+37  ;;  %v1703_v11 = vlaneseq }
 0x26e   :  { %1659 = vmatpush.msrb.mxu3 %v1490_v45  ;;  %v1415_v21 = vsel %vm1412_vm2, %v1414_v24, %v1410_v10  ;;  %vm1717_vm11 = vcmask 57344  }
 0x26f   :  { %v1704_v37 = vshrl.u32 %v1703_v11, 7 }
 0x270   :  { %1660 = vmatpush.msrb.mxu3 %v1475_v16 }
 0x271   :  { %vm1721_vm9 = vcmp.eq.s32.totalorder %v1704_v37, %v1861_v15 }
 0x272   :  { %1661 = vmatpush.msrb.mxu3 %v1460_v4 }
 0x274   :  { %1662 = vmatpush.msrb.mxu3 %v1445_v2 }
 0x276   :  { %1663 = vmatpush.msrb.mxu3 %v1430_v5 }
 0x278   :  { %1664 = vmatpush.msrb.mxu3 %v1415_v21 }
 0x279   :  { %1665 = vmatmul.f32.vlgmr.msrb.gmra.mxu3 %v1642_v62 }
 0x2fc   :  { %v1666_v38 = vpop.f32.mrf.mxu3 }
 0x2fd   :  { %v1667_v59 = vadd.f32 %v1666_v38, %v1647_v3 }
 0x2ff   :  { %v1670_v33 = vsel %vm1669_vm8, %v1667_v59, -inf  ;;  %v1722_v61 = vsel %vm1721_vm9, %v1667_v59, 0.0 }
 0x300   :  { %v1671_v17 = vrot.slane %v1670_v33, 4  ;;  %v1723_v42 = vsel %vm1669_vm8, %v1722_v61, 0.0 }
 0x301   :  { %v1724_v47 = vrot.slane %v1723_v42, 4 }
 0x302   :  { %v1672_v8 = vmax.f32 %v1670_v33, %v1671_v17 }
 0x303   :  { %v1725_v53 = vadd.f32 %v1724_v47, %v1723_v42 }
 0x304   :  { %v1673_v39 = vrot.slane %v1672_v8, 2 }
 0x305   :  { %v1726_v18 = vrot.slane %v1725_v53, 2 }
 0x306   :  { %v1674_v32 = vmax.f32 %v1672_v8, %v1673_v39 }
 0x307   :  { %v1727_v9 = vadd.f32 %v1726_v18, %v1725_v53 }
 0x308   :  { %v1675_v20 = vrot.slane %v1674_v32, 1 }
 0x309   :  { %v1728_v44 = vrot.slane %v1727_v9, 1 }
 0x30a   :  { %v1676_v48 = vmax.f32 %v1674_v32, %v1675_v20 }
 0x30b   :  { %v1729_v25 = vadd.f32 %v1728_v44, %v1727_v9 }
 0x30c   :  { %v1677_v12 = vsub.f32 %v1667_v59, %v1676_v48  ;;  %vm1705_vm1 = vcmp.ge.f32.partialorder %v1667_v59, %v1676_v48 }
 0x30d   :  { %v1706_v22 = vsel %vm1705_vm1, %v1704_v37, 4 }
 0x30e   :  { %v1678_v27 = vmul.f32 1.442695, %v1677_v12  ;;  %v1707_v54 = vsel %vm1669_vm8, %v1706_v22, 2147483647 }
 0x30f   :  { %v1708_v19 = vrot.slane %v1707_v54, 4 }
 0x310   :  { %2054 = vpow2.f32 %v1678_v27 }
 0x311   :  { %vm1709_vm4 = vcmp.lt.s32.totalorder %v1707_v54, %v1708_v19 }
 0x312   :  { %v1710_v0 = vsel %vm1709_vm4, %v1707_v54, %v1708_v19 }
 0x313   :  { %v1711_v60 = vrot.slane %v1710_v0, 2 }
 0x315   :  { %vm1712_vm6 = vcmp.lt.s32.totalorder %v1710_v0, %v1711_v60 }
 0x316   :  { %v2055_v30 = vpop.eup %2054  ;;  %v1713_v26 = vsel %vm1712_vm6, %v1710_v0, %v1711_v60 }
 0x317   :  { %v1680_v23 = vsel %vm1669_vm8, %v2055_v30, 0.0  ;;  %v1714_v6 = vrot.slane %v1713_v26, 1 }
 0x318   :  { %v1681_v63 = vrot.slane %v1680_v23, 4 }
 0x319   :  { %vm1715_vm3 = vcmp.lt.s32.totalorder %v1713_v26, %v1714_v6 }
 0x31a   :  { %v1682_v1 = vadd.f32 %v1681_v63, %v1680_v23  ;;  %v1716_v55 = vsel %vm1715_vm3, %v1713_v26, %v1714_v6 }
 0x31b   :  { %1718 = vst.msk [vmem:[#allocation2] sm:$0x1] %vm1717_vm11, %v1716_v55 }
 0x31c   :  { %v1683_v51 = vrot.slane %v1682_v1, 2  ;;  %1747 = dma.vmem_to_hbm [thread:$0]  %s1743_s26, 16, %s1745_s28, [#allocation3]  }
 0x31e   :  { %v1684_v7 = vadd.f32 %v1683_v51, %v1682_v1 }
 0x320   :  { %v1685_v58 = vrot.slane %v1684_v7, 1 }
 0x322   :  { %v1686_v40 = vadd.f32 %v1685_v58, %v1684_v7 }
 0x324   :  { %2056 = vrcp.f32 %v1686_v40  ;;  %v1698_v16 = vand.u32 2147483648, %v1686_v40  ;;  %v1696_v43 = vand.u32 2147483647, %v1686_v40  ;;  %vm1692_vm14 = vweird.f32 %v1686_v40 }
 0x325   :  { %2058 = vlog2.f32 %v1686_v40 }
 0x326   :  { %v1699_v46 = vor.u32 1.1754944e-38, %v1698_v16  ;;  %vm1697_vm12 = vcmp.eq.f32.partialorder %v1696_v43, 8.507059e+37 }
 0x32a   :  { %v2057_v45 = vpop.eup %2056 }
 0x32b   :  { %v2059_v31 = vpop.eup %2058  ;;  %v1688_v13 = vmul.f32 %v2057_v45, %v1686_v40  ;;  %vm1693_vm15 = vweird.f32 %v2057_v45 }
 0x32c   :  { %v1731_v35 = vmul.f32 0.6931472, %v2059_v31  ;;  %vm1694_vm0 = vmor %vm1692_vm14, %vm1693_vm15 }
 0x32d   :  { %v1689_v52 = vsub.f32 1.0, %v1688_v13 }
 0x32e   :  { %v1732_v49 = vadd.f32 %v1731_v35, %v1676_v48 }
 0x32f   :  { %v1690_v41 = vmul.f32 %v2057_v45, %v1689_v52 }
 0x330   :  { %v1733_v34 = vsub.f32 %v1732_v49, %v1729_v25 }
 0x331   :  { %v1691_v56 = vadd.f32 %v2057_v45, %v1690_v41 }
 0x332   :  { %1734 = vst.msk [vmem:[%s4040_s8] sm:$0x1] %vm1717_vm11, %v1733_v34 }
 0x333   :  { %v1695_v28 = vsel %vm1694_vm0, %v2057_v45, %v1691_v56 }
 0x334   :  { %v1700_v4 = vsel %vm1697_vm12, %v1699_v46, %v1695_v28 }
 0x335   :  { %v1701_v36 = vmul.f32 %v2055_v30, %v1700_v4 }
 0x337   :  { %1702 = vst.msk [vmem:[#allocation4] sm:$0xf] %vm1669_vm8, %v1701_v36 }
 0x338   :  { %1758 = dma.vmem_to_hbm [thread:$0]  %s1754_s29, 64, %s1756_s2, [#allocation5]  }
 0x339   :  { %2108 = dma.done.wait [#allocation3], 16  }
 0x33a   :  { %2109 = vsyncadd [#allocation3], 4294967280 }
 0x33b   :  { %2110 = dma.done.wait [#allocation5], 64  }
 0x33c   :  { %2111 = vsyncadd [#allocation5], 4294967232 }
 0x33d   :  { %1769 = vsyncpa [#allocation3], 1 }
 0x33e   :  { %1770 = vsyncpa [#allocation5], 1 }

</bundles_post_ra>
